<compile_context>
chip_gen: v6e
topology: v6e:2x2x1
jax: 0.10.0
libtpu: 0.0.40
codegen_flags: <defaults>
</compile_context>

<pallas_src>
from functools import partial

import jax
import jax.numpy as jnp
import numpy as np
from jax.experimental import pallas as pl
from jax.experimental.pallas import tpu as pltpu

# ----------------------------- small CLIP-ViT config -----------------------------
IMG = 16          # image size
PATCH = 8         # patch size
CHANS = 3         # input channels
EMBED = 32        # hidden size
HEADS = 4
HEAD_DIM = EMBED // HEADS
MLP = 4 * EMBED
LAYERS = 2
NPATCH = (IMG // PATCH) ** 2        # 4 patches
SEQ = NPATCH + 1                    # +1 for [CLS]
PATCH_DIM = CHANS * PATCH * PATCH   # 192
EPS = 1e-5
DTYPE = jnp.float32                 # reference CLIP runs fp16; f32 used for LN/softmax
B_TILE = 4                          # images per grid step
WCOLS = 4 * EMBED + MLP             # [Wqkv | Wo | W1] lane-concatenated


def _ln(x, g, b):
    """One-pass LayerNorm: mean and mean-of-squares computed together."""
    mu = jnp.mean(x, axis=-1, keepdims=True)
    ms = jnp.mean(x * x, axis=-1, keepdims=True)
    var = ms - mu * mu
    return (x - mu) * jax.lax.rsqrt(var + EPS) * g + b


# ----------------------------- fused Pallas kernel -----------------------------
def vit_kernel(patch_ref, wp_ref, emb_ref, wmats_ref, w2_ref, lvecs_ref,
               bias_ref, out_ref, *, b_tile):
    """Entire CLIP-ViT forward for one tile of b_tile images, fully fused."""
    M = b_tile * SEQ

    # ---- patch embedding (bf16 MXU, f32 accumulate) + [CLS]/pos + pre-LN ----
    # Row 0 of each image's patch block is zero (the [CLS] slot); [CLS] + position
    # embeddings are pre-folded into emb_ref rows [0:M) by the wrapper.
    h = jnp.dot(patch_ref[0], wp_ref[...], preferred_element_type=jnp.float32)   # (M, E) f32
    emb = emb_ref[...]                                                            # (M+2, E) f32
    h = _ln(h + emb[:M], emb[M:M + 1], emb[M + 1:M + 2])

    # ---- block-diagonal attention mask (same-image only), built once ----
    ri = jax.lax.broadcasted_iota(jnp.int32, (M, M), 0)
    ci = jax.lax.broadcasted_iota(jnp.int32, (M, M), 1)
    row_img = jnp.zeros((M, M), jnp.int32)
    col_img = jnp.zeros((M, M), jnp.int32)
    for b in range(1, b_tile):      # avoids vector integer division
        row_img = row_img + (ri >= b * SEQ).astype(jnp.int32)
        col_img = col_img + (ci >= b * SEQ).astype(jnp.int32)
    attn_mask = jnp.where(row_img == col_img,
                          jnp.float32(0.0), jnp.float32(-1e30))                   # (M, M)

    scale = HEAD_DIM ** -0.5
    bmm_nt = (((2,), (2,)), ((0,), (0,)))   # batch over heads, contract last/last
    bmm_nn = (((2,), (1,)), ((0,), (0,)))   # batch over heads, contract last/middle

    for l in range(LAYERS):                 # static unroll (LAYERS == 2)
        wm = wmats_ref[l]                               # (E, 4E+MLP) bf16
        w_qkv = wm[:, 0:3 * EMBED]                      # (E, 3E)
        w_o = wm[:, 3 * EMBED:4 * EMBED]                # (E, E)
        w_1 = wm[:, 4 * EMBED:4 * EMBED + MLP]          # (E, MLP)
        vecs = lvecs_ref[l]                             # (8, E) f32
        ln1_g, ln1_b, b_o = vecs[0:1], vecs[1:2], vecs[2:3]
        ln2_g, ln2_b, b_2 = vecs[3:4], vecs[4:5], vecs[5:6]
        b_qkv = bias_ref[l, 0:1, 0:3 * EMBED]           # (1, 3E) f32
        b_1 = bias_ref[l, 1:2, :]                       # (1, MLP) f32

        # ---------- pre-LN multi-head self-attention ----------
        xn = _ln(h, ln1_g, ln1_b)                                                  # (M, E)
        qkv = jnp.dot(xn.astype(jnp.bfloat16), w_qkv,
                      preferred_element_type=jnp.float32) + b_qkv                  # (M, 3E)
        # head split: lane slices stacked along a new leading (head) axis
        q = jnp.stack([qkv[:, hh * HEAD_DIM:(hh + 1) * HEAD_DIM]
                       for hh in range(HEADS)], axis=0)                            # (H, M, hd)
        k = jnp.stack([qkv[:, EMBED + hh * HEAD_DIM:EMBED + (hh + 1) * HEAD_DIM]
                       for hh in range(HEADS)], axis=0)
        v = jnp.stack([qkv[:, 2 * EMBED + hh * HEAD_DIM:2 * EMBED + (hh + 1) * HEAD_DIM]
                       for hh in range(HEADS)], axis=0)

        s = jax.lax.dot_general(q.astype(jnp.bfloat16), k.astype(jnp.bfloat16),
                                bmm_nt, preferred_element_type=jnp.float32) * scale
        s = s + attn_mask[None]                         # no cross-image attention
        s = s - jnp.max(s, axis=-1, keepdims=True)
        p = jnp.exp(s)
        p = p * pl.reciprocal(jnp.sum(p, axis=-1, keepdims=True), approx=True)
        ctx = jax.lax.dot_general(p.astype(jnp.bfloat16), v.astype(jnp.bfloat16),
                                  bmm_nn, preferred_element_type=jnp.float32)      # (H, M, hd)
        # lane-concatenate heads -> single output-projection matmul
        ctx_cat = jnp.concatenate([ctx[hh] for hh in range(HEADS)], axis=-1)       # (M, E)
        h = h + jnp.dot(ctx_cat.astype(jnp.bfloat16), w_o,
                        preferred_element_type=jnp.float32) + b_o

        # ---------- pre-LN MLP with quick_gelu ----------
        xn2 = _ln(h, ln2_g, ln2_b)
        m = jnp.dot(xn2.astype(jnp.bfloat16), w_1,
                    preferred_element_type=jnp.float32) + b_1                      # (M, MLP)
        m = m * jax.nn.sigmoid(1.702 * m)                                          # quick_gelu
        h = h + jnp.dot(m.astype(jnp.bfloat16), w2_ref[l],
                        preferred_element_type=jnp.float32) + b_2

    out_ref[0] = h.astype(out_ref.dtype)


# ----------------------------- wrapper -----------------------------
def _extract_patches(x_nchw):
    # Equivalent to Conv2d(kernel=stride=PATCH, bias=False) input unfolding.
    B = x_nchw.shape[0]
    g = IMG // PATCH
    p = x_nchw.reshape(B, CHANS, g, PATCH, g, PATCH)
    p = p.transpose(0, 2, 4, 1, 3, 5)             # (B, gh, gw, C, ph, pw)
    return p.reshape(B, NPATCH, PATCH_DIM)


def _pack_params(params, b_tile):
    """Consolidate parameters into a handful of lane-dense slabs (bf16 for
    matmul operands, f32 for LN params / biases)."""
    assert MLP >= 3 * EMBED

    # [cls+pos (tiled per image) | pre-LN gamma | pre-LN beta]  -> (M+2, EMBED)
    cls_pos = params["pos"] + jnp.concatenate(
        [params["cls"], jnp.zeros((NPATCH, EMBED), DTYPE)], axis=0)        # (SEQ, E)
    embslab = jnp.concatenate(
        [jnp.tile(cls_pos, (b_tile, 1)), params["pre_g"], params["pre_b"]], axis=0)

    def stack(name):
        return jnp.stack([lp[name] for lp in params["layers"]], axis=0)

    wqkv = jnp.concatenate([stack("wq"), stack("wk"), stack("wv")], axis=-1)   # (L,E,3E)
    wmats = jnp.concatenate([wqkv, stack("wo"), stack("w1")],
                            axis=-1).astype(jnp.bfloat16)                      # (L,E,4E+MLP)
    w2 = stack("w2").astype(jnp.bfloat16)                                      # (L,MLP,E)

    lvecs = jnp.concatenate(
        [stack("ln1_g"), stack("ln1_b"), stack("bo"),
         stack("ln2_g"), stack("ln2_b"), stack("b2"),
         jnp.zeros((LAYERS, 2, EMBED), DTYPE)], axis=1)                        # (L,8,E)

    bqkv = jnp.concatenate([stack("bq"), stack("bk"), stack("bv")], axis=-1)   # (L,1,3E)
    bqkv = jnp.pad(bqkv, ((0, 0), (0, 0), (0, MLP - 3 * EMBED)))               # (L,1,MLP)
    bias128 = jnp.concatenate([bqkv, stack("b1")], axis=1)                     # (L,2,MLP)

    return dict(wp=params["wp"].astype(jnp.bfloat16), embslab=embslab,
                wmats=wmats, w2=w2, lvecs=lvecs, bias128=bias128)


def clip_vit_forward(x_nchw, params):
    B = x_nchw.shape[0]
    b_tile = min(B_TILE, B)
    pad = (-B) % b_tile
    Bp = B + pad
    M = b_tile * SEQ
    num_tiles = Bp // b_tile

    x = x_nchw.astype(DTYPE)
    if pad:
        x = jnp.concatenate([x, jnp.zeros((pad, CHANS, IMG, IMG), DTYPE)], axis=0)
    patches = _extract_patches(x)
    # Prepend a zero row per image so the patch-embed matmul directly yields SEQ
    # rows ([CLS] slot); [CLS]+pos are folded into embslab in the kernel.
    patches = jnp.concatenate(
        [jnp.zeros((Bp, 1, PATCH_DIM), DTYPE), patches], axis=1)               # (Bp,SEQ,PD)
    patches = patches.reshape(num_tiles, M, PATCH_DIM).astype(jnp.bfloat16)

    pk = _pack_params(params, b_tile)

    in_specs = [
        pl.BlockSpec((1, M, PATCH_DIM), lambda t: (t, 0, 0)),          # patches (per tile)
        pl.BlockSpec((PATCH_DIM, EMBED), lambda t: (0, 0)),            # patch-embed weight
        pl.BlockSpec((M + 2, EMBED), lambda t: (0, 0)),                # [cls+pos|pre-LN]
        pl.BlockSpec((LAYERS, EMBED, WCOLS), lambda t: (0, 0, 0)),     # [Wqkv|Wo|W1]
        pl.BlockSpec((LAYERS, MLP, EMBED), lambda t: (0, 0, 0)),       # W2
        pl.BlockSpec((LAYERS, 8, EMBED), lambda t: (0, 0, 0)),         # LN / bias vectors
        pl.BlockSpec((LAYERS, 2, MLP), lambda t: (0, 0, 0)),           # [qkv bias|fc1 bias]
    ]

    hidden = pl.pallas_call(
        partial(vit_kernel, b_tile=b_tile),
        out_shape=jax.ShapeDtypeStruct((num_tiles, M, EMBED), DTYPE),
        grid=(num_tiles,),
        in_specs=in_specs,
        out_specs=pl.BlockSpec((1, M, EMBED), lambda t: (t, 0, 0)),
        compiler_params=pltpu.CompilerParams(dimension_semantics=("parallel",)),
        # NOTE: VMEM usage is tiny at this config; when scaling to real CLIP sizes
        # set vmem_limit_bytes explicitly and stream per-layer weights instead.
    )(patches, pk["wp"], pk["embslab"], pk["wmats"], pk["w2"], pk["lvecs"],
      pk["bias128"])

    # forward() of the PyTorch module returns x[0] == last_hidden_state
    return hidden.reshape(Bp, SEQ, EMBED)[:B]


# ----------------------------- pure-JAX reference -----------------------------
def reference_forward(x_nchw, params):
    patches = _extract_patches(x_nchw.astype(DTYPE))
    emb = patches @ params["wp"]                                   # (B, P, D)
    cls = jnp.broadcast_to(params["cls"], (x_nchw.shape[0], 1, EMBED))
    h = jnp.concatenate([cls, emb], axis=1) + params["pos"][None]
    h = _ln(h, params["pre_g"], params["pre_b"])
    scale = HEAD_DIM ** -0.5
    for lp in params["layers"]:
        xn = _ln(h, lp["ln1_g"], lp["ln1_b"])
        q = xn @ lp["wq"] + lp["bq"]
        k = xn @ lp["wk"] + lp["bk"]
        v = xn @ lp["wv"] + lp["bv"]
        B = h.shape[0]
        q = q.reshape(B, SEQ, HEADS, HEAD_DIM)
        k = k.reshape(B, SEQ, HEADS, HEAD_DIM)
        v = v.reshape(B, SEQ, HEADS, HEAD_DIM)
        s = jnp.einsum("bqhd,bkhd->bhqk", q, k) * scale
        p = jax.nn.softmax(s, axis=-1)
        ctx = jnp.einsum("bhqk,bkhd->bqhd", p, v).reshape(B, SEQ, EMBED)
        h = h + (ctx @ lp["wo"] + lp["bo"])
        xn2 = _ln(h, lp["ln2_g"], lp["ln2_b"])
        m = xn2 @ lp["w1"] + lp["b1"]
        m = m * jax.nn.sigmoid(1.702 * m)
        h = h + (m @ lp["w2"] + lp["b2"])
    return h


# ----------------------------- params -----------------------------
def init_params(key):
    def nrm(k, shape, scale=0.02):
        return (scale * jax.random.normal(k, shape)).astype(DTYPE)

    keys = jax.random.split(key, 4 + 8 * LAYERS)
    params = {
        "wp": nrm(keys[0], (PATCH_DIM, EMBED)),     # patch conv weight, bias=False (CLIP)
        "cls": nrm(keys[1], (1, EMBED)),
        "pos": nrm(keys[2], (SEQ, EMBED)),
        "pre_g": jnp.ones((1, EMBED), DTYPE),
        "pre_b": jnp.zeros((1, EMBED), DTYPE),
        "layers": [],
    }
    for l in range(LAYERS):
        ks = jax.random.split(keys[4 + l], 8)
        params["layers"].append({
            "ln1_g": jnp.ones((1, EMBED), DTYPE), "ln1_b": jnp.zeros((1, EMBED), DTYPE),
            "wq": nrm(ks[0], (EMBED, EMBED)), "bq": jnp.zeros((1, EMBED), DTYPE),
            "wk": nrm(ks[1], (EMBED, EMBED)), "bk": jnp.zeros((1, EMBED), DTYPE),
            "wv": nrm(ks[2], (EMBED, EMBED)), "bv": jnp.zeros((1, EMBED), DTYPE),
            "wo": nrm(ks[3], (EMBED, EMBED)), "bo": jnp.zeros((1, EMBED), DTYPE),
            "ln2_g": jnp.ones((1, EMBED), DTYPE), "ln2_b": jnp.zeros((1, EMBED), DTYPE),
            "w1": nrm(ks[4], (EMBED, MLP)), "b1": jnp.zeros((1, MLP), DTYPE),
            "w2": nrm(ks[5], (MLP, EMBED)), "b2": jnp.zeros((1, EMBED), DTYPE),
        })
    return params


if __name__ == "__main__":
    key = jax.random.PRNGKey(0)
    k_x, k_p = jax.random.split(key)
    # 8 images -> 2 batch tiles of 4 (even tile count keeps both v7x cores busy).
    x = jax.random.normal(k_x, (8, CHANS, IMG, IMG), dtype=DTYPE)   # NCHW like PyTorch
    params = init_params(k_p)

    out = jax.jit(clip_vit_forward)(x, params)
    out = jax.block_until_ready(out)

    assert out.shape == (8, SEQ, EMBED), out.shape
    assert bool(jnp.all(jnp.isfinite(out)))

    ref = reference_forward(x, params)
    # bf16 matmul operands + approximate softmax reciprocal => loose-ish tolerance.
    np.testing.assert_allclose(np.asarray(out), np.asarray(ref), rtol=2e-2, atol=2e-2)

    print("KERNEL_OK")
</pallas_src>

<mosaic_0001>
module attributes {stable_mosaic.version = 11 : i64} {
  func.func @vit_kernel(%arg0: i32, %arg1: memref<1x20x192xbf16, #tpu.memory_space<vmem>>, %arg2: memref<192x32xbf16, #tpu.memory_space<vmem>>, %arg3: memref<22x32xf32, #tpu.memory_space<vmem>>, %arg4: memref<2x32x256xbf16, #tpu.memory_space<vmem>>, %arg5: memref<2x128x32xbf16, #tpu.memory_space<vmem>>, %arg6: memref<2x8x32xf32, #tpu.memory_space<vmem>>, %arg7: memref<2x2x128xf32, #tpu.memory_space<vmem>>, %arg8: memref<1x20x32xf32, #tpu.memory_space<vmem>>) attributes {dimension_semantics = [#tpu.dimension_semantics<parallel>], iteration_bounds = array<i64: 2>, scalar_prefetch = 0 : i64, scratch_operands = 0 : i64, tpu.core_type = #tpu.core_type<tc>, window_params = [{transform_indices = @transform_0, window_bounds = array<i64: 1, 20, 192>}, {pipeline_mode = #tpu.pipeline_mode<synchronous>, transform_indices = @transform_1, window_bounds = array<i64: 192, 32>}, {pipeline_mode = #tpu.pipeline_mode<synchronous>, transform_indices = @transform_2, window_bounds = array<i64: 22, 32>}, {pipeline_mode = #tpu.pipeline_mode<synchronous>, transform_indices = @transform_3, window_bounds = array<i64: 2, 32, 256>}, {pipeline_mode = #tpu.pipeline_mode<synchronous>, transform_indices = @transform_4, window_bounds = array<i64: 2, 128, 32>}, {pipeline_mode = #tpu.pipeline_mode<synchronous>, transform_indices = @transform_5, window_bounds = array<i64: 2, 8, 32>}, {pipeline_mode = #tpu.pipeline_mode<synchronous>, transform_indices = @transform_6, window_bounds = array<i64: 2, 2, 128>}, {transform_indices = @transform_7, window_bounds = array<i64: 1, 20, 32>}]} {
    %c0 = arith.constant 0 : index
    %c0_0 = arith.constant 0 : index
    %c0_1 = arith.constant 0 : index
    %0 = vector.load %arg1[%c0, %c0_0, %c0_1] : memref<1x20x192xbf16, #tpu.memory_space<vmem>>, vector<1x20x192xbf16>
    %1 = vector.shape_cast %0 : vector<1x20x192xbf16> to vector<20x192xbf16>
    %c0_2 = arith.constant 0 : index
    %c0_3 = arith.constant 0 : index
    %2 = vector.load %arg2[%c0_2, %c0_3] : memref<192x32xbf16, #tpu.memory_space<vmem>>, vector<192x32xbf16>
    %cst = arith.constant dense<0.000000e+00> : vector<20x32xf32>
    %3 = tpu.matmul %1, %2, %cst {dimension_numbers = #tpu.dot_dimension_numbers<[1], [0], [0], [1], [0, 0, 1, 1], [], []>} : vector<20x192xbf16>, vector<192x32xbf16>, vector<20x32xf32> -> vector<20x32xf32>
    %c0_4 = arith.constant 0 : index
    %c0_5 = arith.constant 0 : index
    %4 = vector.load %arg3[%c0_4, %c0_5] : memref<22x32xf32, #tpu.memory_space<vmem>>, vector<22x32xf32>
    %5 = vector.extract_strided_slice %4 {offsets = [0, 0], sizes = [20, 32], strides = [1, 1]} : vector<22x32xf32> to vector<20x32xf32>
    %6 = arith.addf %3, %5 : vector<20x32xf32>
    %7 = vector.extract_strided_slice %4 {offsets = [20, 0], sizes = [1, 32], strides = [1, 1]} : vector<22x32xf32> to vector<1x32xf32>
    %8 = vector.extract_strided_slice %4 {offsets = [21, 0], sizes = [1, 32], strides = [1, 1]} : vector<22x32xf32> to vector<1x32xf32>
    %cst_6 = arith.constant dense<0.000000e+00> : vector<20xf32>
    %9 = vector.multi_reduction <add>, %6, %cst_6 [1] : vector<20x32xf32> to vector<20xf32>
    %10 = vector.shape_cast %9 : vector<20xf32> to vector<20x1xf32>
    %cst_7 = arith.constant 3.200000e+01 : f32
    %11 = vector.broadcast %cst_7 : f32 to vector<20x1xf32>
    %12 = arith.divf %10, %11 : vector<20x1xf32>
    %13 = arith.mulf %6, %6 : vector<20x32xf32>
    %cst_8 = arith.constant dense<0.000000e+00> : vector<20xf32>
    %14 = vector.multi_reduction <add>, %13, %cst_8 [1] : vector<20x32xf32> to vector<20xf32>
    %15 = vector.shape_cast %14 : vector<20xf32> to vector<20x1xf32>
    %cst_9 = arith.constant 3.200000e+01 : f32
    %16 = vector.broadcast %cst_9 : f32 to vector<20x1xf32>
    %17 = arith.divf %15, %16 : vector<20x1xf32>
    %18 = arith.mulf %12, %12 : vector<20x1xf32>
    %19 = arith.subf %17, %18 : vector<20x1xf32>
    %20 = vector.broadcast %12 : vector<20x1xf32> to vector<20x32xf32>
    %21 = arith.subf %6, %20 : vector<20x32xf32>
    %cst_10 = arith.constant 9.99999974E-6 : f32
    %22 = vector.broadcast %cst_10 : f32 to vector<20x1xf32>
    %23 = arith.addf %19, %22 : vector<20x1xf32>
    %24 = math.rsqrt %23 : vector<20x1xf32>
    %25 = vector.broadcast %24 : vector<20x1xf32> to vector<20x32xf32>
    %26 = arith.mulf %21, %25 : vector<20x32xf32>
    %27 = vector.broadcast %7 : vector<1x32xf32> to vector<20x32xf32>
    %28 = arith.mulf %26, %27 : vector<20x32xf32>
    %29 = vector.broadcast %8 : vector<1x32xf32> to vector<20x32xf32>
    %30 = arith.addf %28, %29 : vector<20x32xf32>
    %31 = tpu.iota {dimensions = array<i32: 0>} : vector<20x20xi32>
    %32 = tpu.iota {dimensions = array<i32: 1>} : vector<20x20xi32>
    %c0_i32 = arith.constant 0 : i32
    %33 = vector.broadcast %c0_i32 : i32 to vector<20x20xi32>
    %c0_i32_11 = arith.constant 0 : i32
    %34 = vector.broadcast %c0_i32_11 : i32 to vector<20x20xi32>
    %c5_i32 = arith.constant 5 : i32
    %35 = vector.broadcast %c5_i32 : i32 to vector<20x20xi32>
    %36 = arith.cmpi sge, %31, %35 : vector<20x20xi32>
    %37 = arith.extui %36 : vector<20x20xi1> to vector<20x20xi32>
    %38 = arith.addi %33, %37 : vector<20x20xi32>
    %c5_i32_12 = arith.constant 5 : i32
    %39 = vector.broadcast %c5_i32_12 : i32 to vector<20x20xi32>
    %40 = arith.cmpi sge, %32, %39 : vector<20x20xi32>
    %41 = arith.extui %40 : vector<20x20xi1> to vector<20x20xi32>
    %42 = arith.addi %34, %41 : vector<20x20xi32>
    %c10_i32 = arith.constant 10 : i32
    %43 = vector.broadcast %c10_i32 : i32 to vector<20x20xi32>
    %44 = arith.cmpi sge, %31, %43 : vector<20x20xi32>
    %45 = arith.extui %44 : vector<20x20xi1> to vector<20x20xi32>
    %46 = arith.addi %38, %45 : vector<20x20xi32>
    %c10_i32_13 = arith.constant 10 : i32
    %47 = vector.broadcast %c10_i32_13 : i32 to vector<20x20xi32>
    %48 = arith.cmpi sge, %32, %47 : vector<20x20xi32>
    %49 = arith.extui %48 : vector<20x20xi1> to vector<20x20xi32>
    %50 = arith.addi %42, %49 : vector<20x20xi32>
    %c15_i32 = arith.constant 15 : i32
    %51 = vector.broadcast %c15_i32 : i32 to vector<20x20xi32>
    %52 = arith.cmpi sge, %31, %51 : vector<20x20xi32>
    %53 = arith.extui %52 : vector<20x20xi1> to vector<20x20xi32>
    %54 = arith.addi %46, %53 : vector<20x20xi32>
    %c15_i32_14 = arith.constant 15 : i32
    %55 = vector.broadcast %c15_i32_14 : i32 to vector<20x20xi32>
    %56 = arith.cmpi sge, %32, %55 : vector<20x20xi32>
    %57 = arith.extui %56 : vector<20x20xi1> to vector<20x20xi32>
    %58 = arith.addi %50, %57 : vector<20x20xi32>
    %59 = arith.cmpi eq, %54, %58 : vector<20x20xi32>
    %cst_15 = arith.constant 0.000000e+00 : f32
    %cst_16 = arith.constant -1.000000e+30 : f32
    %60 = vector.broadcast %cst_15 : f32 to vector<20x20xf32>
    %61 = vector.broadcast %cst_16 : f32 to vector<20x20xf32>
    %62 = arith.select %59, %60, %61 : vector<20x20xi1>, vector<20x20xf32>
    %c0_17 = arith.constant 0 : index
    %c0_18 = arith.constant 0 : index
    %c0_19 = arith.constant 0 : index
    %63 = vector.load %arg4[%c0_17, %c0_18, %c0_19] : memref<2x32x256xbf16, #tpu.memory_space<vmem>>, vector<1x32x256xbf16>
    %64 = vector.shape_cast %63 : vector<1x32x256xbf16> to vector<32x256xbf16>
    %65 = vector.extract_strided_slice %64 {offsets = [0, 0], sizes = [32, 96], strides = [1, 1]} : vector<32x256xbf16> to vector<32x96xbf16>
    %66 = vector.extract_strided_slice %64 {offsets = [0, 96], sizes = [32, 32], strides = [1, 1]} : vector<32x256xbf16> to vector<32x32xbf16>
    %67 = vector.extract_strided_slice %64 {offsets = [0, 128], sizes = [32, 128], strides = [1, 1]} : vector<32x256xbf16> to vector<32x128xbf16>
    %c0_20 = arith.constant 0 : index
    %c0_21 = arith.constant 0 : index
    %c0_22 = arith.constant 0 : index
    %68 = vector.load %arg6[%c0_20, %c0_21, %c0_22] : memref<2x8x32xf32, #tpu.memory_space<vmem>>, vector<1x8x32xf32>
    %69 = vector.shape_cast %68 : vector<1x8x32xf32> to vector<8x32xf32>
    %70 = vector.extract_strided_slice %69 {offsets = [0, 0], sizes = [1, 32], strides = [1, 1]} : vector<8x32xf32> to vector<1x32xf32>
    %71 = vector.extract_strided_slice %69 {offsets = [1, 0], sizes = [1, 32], strides = [1, 1]} : vector<8x32xf32> to vector<1x32xf32>
    %72 = vector.extract_strided_slice %69 {offsets = [2, 0], sizes = [1, 32], strides = [1, 1]} : vector<8x32xf32> to vector<1x32xf32>
    %73 = vector.extract_strided_slice %69 {offsets = [3, 0], sizes = [1, 32], strides = [1, 1]} : vector<8x32xf32> to vector<1x32xf32>
    %74 = vector.extract_strided_slice %69 {offsets = [4, 0], sizes = [1, 32], strides = [1, 1]} : vector<8x32xf32> to vector<1x32xf32>
    %75 = vector.extract_strided_slice %69 {offsets = [5, 0], sizes = [1, 32], strides = [1, 1]} : vector<8x32xf32> to vector<1x32xf32>
    %c0_23 = arith.constant 0 : index
    %c0_24 = arith.constant 0 : index
    %c0_25 = arith.constant 0 : index
    %76 = vector.load %arg7[%c0_23, %c0_24, %c0_25] : memref<2x2x128xf32, #tpu.memory_space<vmem>>, vector<1x1x96xf32>
    %77 = vector.shape_cast %76 : vector<1x1x96xf32> to vector<1x96xf32>
    %c0_26 = arith.constant 0 : index
    %c1 = arith.constant 1 : index
    %c0_27 = arith.constant 0 : index
    %78 = vector.load %arg7[%c0_26, %c1, %c0_27] : memref<2x2x128xf32, #tpu.memory_space<vmem>>, vector<1x1x128xf32>
    %79 = vector.shape_cast %78 : vector<1x1x128xf32> to vector<1x128xf32>
    %cst_28 = arith.constant dense<0.000000e+00> : vector<20xf32>
    %80 = vector.multi_reduction <add>, %30, %cst_28 [1] : vector<20x32xf32> to vector<20xf32>
    %81 = vector.shape_cast %80 : vector<20xf32> to vector<20x1xf32>
    %cst_29 = arith.constant 3.200000e+01 : f32
    %82 = vector.broadcast %cst_29 : f32 to vector<20x1xf32>
    %83 = arith.divf %81, %82 : vector<20x1xf32>
    %84 = arith.mulf %30, %30 : vector<20x32xf32>
    %cst_30 = arith.constant dense<0.000000e+00> : vector<20xf32>
    %85 = vector.multi_reduction <add>, %84, %cst_30 [1] : vector<20x32xf32> to vector<20xf32>
    %86 = vector.shape_cast %85 : vector<20xf32> to vector<20x1xf32>
    %cst_31 = arith.constant 3.200000e+01 : f32
    %87 = vector.broadcast %cst_31 : f32 to vector<20x1xf32>
    %88 = arith.divf %86, %87 : vector<20x1xf32>
    %89 = arith.mulf %83, %83 : vector<20x1xf32>
    %90 = arith.subf %88, %89 : vector<20x1xf32>
    %91 = vector.broadcast %83 : vector<20x1xf32> to vector<20x32xf32>
    %92 = arith.subf %30, %91 : vector<20x32xf32>
    %cst_32 = arith.constant 9.99999974E-6 : f32
    %93 = vector.broadcast %cst_32 : f32 to vector<20x1xf32>
    %94 = arith.addf %90, %93 : vector<20x1xf32>
    %95 = math.rsqrt %94 : vector<20x1xf32>
    %96 = vector.broadcast %95 : vector<20x1xf32> to vector<20x32xf32>
    %97 = arith.mulf %92, %96 : vector<20x32xf32>
    %98 = vector.broadcast %70 : vector<1x32xf32> to vector<20x32xf32>
    %99 = arith.mulf %97, %98 : vector<20x32xf32>
    %100 = vector.broadcast %71 : vector<1x32xf32> to vector<20x32xf32>
    %101 = arith.addf %99, %100 : vector<20x32xf32>
    %102 = arith.truncf %101 : vector<20x32xf32> to vector<20x32xbf16>
    %cst_33 = arith.constant dense<0.000000e+00> : vector<20x96xf32>
    %103 = tpu.matmul %102, %65, %cst_33 {dimension_numbers = #tpu.dot_dimension_numbers<[1], [0], [0], [1], [0, 0, 1, 1], [], []>} : vector<20x32xbf16>, vector<32x96xbf16>, vector<20x96xf32> -> vector<20x96xf32>
    %104 = vector.broadcast %77 : vector<1x96xf32> to vector<20x96xf32>
    %105 = arith.addf %103, %104 : vector<20x96xf32>
    %106 = vector.extract_strided_slice %105 {offsets = [0, 0], sizes = [20, 8], strides = [1, 1]} : vector<20x96xf32> to vector<20x8xf32>
    %107 = vector.extract_strided_slice %105 {offsets = [0, 8], sizes = [20, 8], strides = [1, 1]} : vector<20x96xf32> to vector<20x8xf32>
    %108 = vector.extract_strided_slice %105 {offsets = [0, 16], sizes = [20, 8], strides = [1, 1]} : vector<20x96xf32> to vector<20x8xf32>
    %109 = vector.extract_strided_slice %105 {offsets = [0, 24], sizes = [20, 8], strides = [1, 1]} : vector<20x96xf32> to vector<20x8xf32>
    %110 = vector.shape_cast %106 : vector<20x8xf32> to vector<1x20x8xf32>
    %111 = vector.shape_cast %107 : vector<20x8xf32> to vector<1x20x8xf32>
    %112 = vector.shape_cast %108 : vector<20x8xf32> to vector<1x20x8xf32>
    %113 = vector.shape_cast %109 : vector<20x8xf32> to vector<1x20x8xf32>
    %114 = tpu.concatenate %110, %111, %112, %113 in 0 : vector<1x20x8xf32>, vector<1x20x8xf32>, vector<1x20x8xf32>, vector<1x20x8xf32> -> vector<4x20x8xf32>
    %115 = vector.extract_strided_slice %105 {offsets = [0, 32], sizes = [20, 8], strides = [1, 1]} : vector<20x96xf32> to vector<20x8xf32>
    %116 = vector.extract_strided_slice %105 {offsets = [0, 40], sizes = [20, 8], strides = [1, 1]} : vector<20x96xf32> to vector<20x8xf32>
    %117 = vector.extract_strided_slice %105 {offsets = [0, 48], sizes = [20, 8], strides = [1, 1]} : vector<20x96xf32> to vector<20x8xf32>
    %118 = vector.extract_strided_slice %105 {offsets = [0, 56], sizes = [20, 8], strides = [1, 1]} : vector<20x96xf32> to vector<20x8xf32>
    %119 = vector.shape_cast %115 : vector<20x8xf32> to vector<1x20x8xf32>
    %120 = vector.shape_cast %116 : vector<20x8xf32> to vector<1x20x8xf32>
    %121 = vector.shape_cast %117 : vector<20x8xf32> to vector<1x20x8xf32>
    %122 = vector.shape_cast %118 : vector<20x8xf32> to vector<1x20x8xf32>
    %123 = tpu.concatenate %119, %120, %121, %122 in 0 : vector<1x20x8xf32>, vector<1x20x8xf32>, vector<1x20x8xf32>, vector<1x20x8xf32> -> vector<4x20x8xf32>
    %124 = vector.extract_strided_slice %105 {offsets = [0, 64], sizes = [20, 8], strides = [1, 1]} : vector<20x96xf32> to vector<20x8xf32>
    %125 = vector.extract_strided_slice %105 {offsets = [0, 72], sizes = [20, 8], strides = [1, 1]} : vector<20x96xf32> to vector<20x8xf32>
    %126 = vector.extract_strided_slice %105 {offsets = [0, 80], sizes = [20, 8], strides = [1, 1]} : vector<20x96xf32> to vector<20x8xf32>
    %127 = vector.extract_strided_slice %105 {offsets = [0, 88], sizes = [20, 8], strides = [1, 1]} : vector<20x96xf32> to vector<20x8xf32>
    %128 = vector.shape_cast %124 : vector<20x8xf32> to vector<1x20x8xf32>
    %129 = vector.shape_cast %125 : vector<20x8xf32> to vector<1x20x8xf32>
    %130 = vector.shape_cast %126 : vector<20x8xf32> to vector<1x20x8xf32>
    %131 = vector.shape_cast %127 : vector<20x8xf32> to vector<1x20x8xf32>
    %132 = tpu.concatenate %128, %129, %130, %131 in 0 : vector<1x20x8xf32>, vector<1x20x8xf32>, vector<1x20x8xf32>, vector<1x20x8xf32> -> vector<4x20x8xf32>
    %133 = arith.truncf %114 : vector<4x20x8xf32> to vector<4x20x8xbf16>
    %134 = arith.truncf %123 : vector<4x20x8xf32> to vector<4x20x8xbf16>
    %cst_34 = arith.constant dense<0.000000e+00> : vector<4x20x20xf32>
    %135 = tpu.matmul %133, %134, %cst_34 {dimension_numbers = #tpu.dot_dimension_numbers<[2], [2], [1], [1], [0, 0, 0, 1, 1, 1], [0], [0]>} : vector<4x20x8xbf16>, vector<4x20x8xbf16>, vector<4x20x20xf32> -> vector<4x20x20xf32>
    %cst_35 = arith.constant 0.353553385 : f32
    %136 = vector.broadcast %cst_35 : f32 to vector<4x20x20xf32>
    %137 = arith.mulf %135, %136 : vector<4x20x20xf32>
    %138 = vector.shape_cast %62 : vector<20x20xf32> to vector<1x20x20xf32>
    %139 = vector.broadcast %138 : vector<1x20x20xf32> to vector<4x20x20xf32>
    %140 = arith.addf %137, %139 : vector<4x20x20xf32>
    %cst_36 = arith.constant dense<0xFF800000> : vector<4x20xf32>
    %141 = vector.multi_reduction <maximumf>, %140, %cst_36 [2] : vector<4x20x20xf32> to vector<4x20xf32>
    %142 = vector.shape_cast %141 : vector<4x20xf32> to vector<4x20x1xf32>
    %143 = vector.broadcast %142 : vector<4x20x1xf32> to vector<4x20x20xf32>
    %144 = arith.subf %140, %143 : vector<4x20x20xf32>
    %145 = math.exp %144 : vector<4x20x20xf32>
    %cst_37 = arith.constant dense<0.000000e+00> : vector<4x20xf32>
    %146 = vector.multi_reduction <add>, %145, %cst_37 [2] : vector<4x20x20xf32> to vector<4x20xf32>
    %147 = vector.shape_cast %146 : vector<4x20xf32> to vector<4x20x1xf32>
    %148 = tpu.reciprocal %147 {approx = true} : vector<4x20x1xf32> -> vector<4x20x1xf32>
    %149 = vector.broadcast %148 : vector<4x20x1xf32> to vector<4x20x20xf32>
    %150 = arith.mulf %145, %149 : vector<4x20x20xf32>
    %151 = arith.truncf %150 : vector<4x20x20xf32> to vector<4x20x20xbf16>
    %152 = arith.truncf %132 : vector<4x20x8xf32> to vector<4x20x8xbf16>
    %cst_38 = arith.constant dense<0.000000e+00> : vector<4x20x8xf32>
    %153 = tpu.matmul %151, %152, %cst_38 {dimension_numbers = #tpu.dot_dimension_numbers<[2], [1], [1], [2], [0, 0, 0, 1, 1, 2], [0], [0]>} : vector<4x20x20xbf16>, vector<4x20x8xbf16>, vector<4x20x8xf32> -> vector<4x20x8xf32>
    %154 = vector.extract_strided_slice %153 {offsets = [0, 0, 0], sizes = [1, 20, 8], strides = [1, 1, 1]} : vector<4x20x8xf32> to vector<1x20x8xf32>
    %155 = vector.shape_cast %154 : vector<1x20x8xf32> to vector<20x8xf32>
    %156 = vector.extract_strided_slice %153 {offsets = [1, 0, 0], sizes = [1, 20, 8], strides = [1, 1, 1]} : vector<4x20x8xf32> to vector<1x20x8xf32>
    %157 = vector.shape_cast %156 : vector<1x20x8xf32> to vector<20x8xf32>
    %158 = vector.extract_strided_slice %153 {offsets = [2, 0, 0], sizes = [1, 20, 8], strides = [1, 1, 1]} : vector<4x20x8xf32> to vector<1x20x8xf32>
    %159 = vector.shape_cast %158 : vector<1x20x8xf32> to vector<20x8xf32>
    %160 = vector.extract_strided_slice %153 {offsets = [3, 0, 0], sizes = [1, 20, 8], strides = [1, 1, 1]} : vector<4x20x8xf32> to vector<1x20x8xf32>
    %161 = vector.shape_cast %160 : vector<1x20x8xf32> to vector<20x8xf32>
    %162 = tpu.concatenate %155, %157, %159, %161 in 1 : vector<20x8xf32>, vector<20x8xf32>, vector<20x8xf32>, vector<20x8xf32> -> vector<20x32xf32>
    %163 = arith.truncf %162 : vector<20x32xf32> to vector<20x32xbf16>
    %cst_39 = arith.constant dense<0.000000e+00> : vector<20x32xf32>
    %164 = tpu.matmul %163, %66, %cst_39 {dimension_numbers = #tpu.dot_dimension_numbers<[1], [0], [0], [1], [0, 0, 1, 1], [], []>} : vector<20x32xbf16>, vector<32x32xbf16>, vector<20x32xf32> -> vector<20x32xf32>
    %165 = arith.addf %30, %164 : vector<20x32xf32>
    %166 = vector.broadcast %72 : vector<1x32xf32> to vector<20x32xf32>
    %167 = arith.addf %165, %166 : vector<20x32xf32>
    %cst_40 = arith.constant dense<0.000000e+00> : vector<20xf32>
    %168 = vector.multi_reduction <add>, %167, %cst_40 [1] : vector<20x32xf32> to vector<20xf32>
    %169 = vector.shape_cast %168 : vector<20xf32> to vector<20x1xf32>
    %cst_41 = arith.constant 3.200000e+01 : f32
    %170 = vector.broadcast %cst_41 : f32 to vector<20x1xf32>
    %171 = arith.divf %169, %170 : vector<20x1xf32>
    %172 = arith.mulf %167, %167 : vector<20x32xf32>
    %cst_42 = arith.constant dense<0.000000e+00> : vector<20xf32>
    %173 = vector.multi_reduction <add>, %172, %cst_42 [1] : vector<20x32xf32> to vector<20xf32>
    %174 = vector.shape_cast %173 : vector<20xf32> to vector<20x1xf32>
    %cst_43 = arith.constant 3.200000e+01 : f32
    %175 = vector.broadcast %cst_43 : f32 to vector<20x1xf32>
    %176 = arith.divf %174, %175 : vector<20x1xf32>
    %177 = arith.mulf %171, %171 : vector<20x1xf32>
    %178 = arith.subf %176, %177 : vector<20x1xf32>
    %179 = vector.broadcast %171 : vector<20x1xf32> to vector<20x32xf32>
    %180 = arith.subf %167, %179 : vector<20x32xf32>
    %cst_44 = arith.constant 9.99999974E-6 : f32
    %181 = vector.broadcast %cst_44 : f32 to vector<20x1xf32>
    %182 = arith.addf %178, %181 : vector<20x1xf32>
    %183 = math.rsqrt %182 : vector<20x1xf32>
    %184 = vector.broadcast %183 : vector<20x1xf32> to vector<20x32xf32>
    %185 = arith.mulf %180, %184 : vector<20x32xf32>
    %186 = vector.broadcast %73 : vector<1x32xf32> to vector<20x32xf32>
    %187 = arith.mulf %185, %186 : vector<20x32xf32>
    %188 = vector.broadcast %74 : vector<1x32xf32> to vector<20x32xf32>
    %189 = arith.addf %187, %188 : vector<20x32xf32>
    %190 = arith.truncf %189 : vector<20x32xf32> to vector<20x32xbf16>
    %cst_45 = arith.constant dense<0.000000e+00> : vector<20x128xf32>
    %191 = tpu.matmul %190, %67, %cst_45 {dimension_numbers = #tpu.dot_dimension_numbers<[1], [0], [0], [1], [0, 0, 1, 1], [], []>} : vector<20x32xbf16>, vector<32x128xbf16>, vector<20x128xf32> -> vector<20x128xf32>
    %192 = vector.broadcast %79 : vector<1x128xf32> to vector<20x128xf32>
    %193 = arith.addf %191, %192 : vector<20x128xf32>
    %cst_46 = arith.constant 1.702000e+00 : f32
    %194 = vector.broadcast %cst_46 : f32 to vector<20x128xf32>
    %195 = arith.mulf %194, %193 : vector<20x128xf32>
    %196 = arith.negf %195 : vector<20x128xf32>
    %197 = math.exp %196 : vector<20x128xf32>
    %cst_47 = arith.constant 1.000000e+00 : f32
    %198 = vector.broadcast %cst_47 : f32 to vector<20x128xf32>
    %199 = arith.addf %198, %197 : vector<20x128xf32>
    %200 = arith.divf %198, %199 : vector<20x128xf32>
    %201 = arith.mulf %193, %200 : vector<20x128xf32>
    %202 = arith.truncf %201 : vector<20x128xf32> to vector<20x128xbf16>
    %c0_48 = arith.constant 0 : index
    %c0_49 = arith.constant 0 : index
    %c0_50 = arith.constant 0 : index
    %203 = vector.load %arg5[%c0_48, %c0_49, %c0_50] : memref<2x128x32xbf16, #tpu.memory_space<vmem>>, vector<1x128x32xbf16>
    %204 = vector.shape_cast %203 : vector<1x128x32xbf16> to vector<128x32xbf16>
    %cst_51 = arith.constant dense<0.000000e+00> : vector<20x32xf32>
    %205 = tpu.matmul %202, %204, %cst_51 {dimension_numbers = #tpu.dot_dimension_numbers<[1], [0], [0], [1], [0, 0, 1, 1], [], []>} : vector<20x128xbf16>, vector<128x32xbf16>, vector<20x32xf32> -> vector<20x32xf32>
    %206 = arith.addf %167, %205 : vector<20x32xf32>
    %207 = vector.broadcast %75 : vector<1x32xf32> to vector<20x32xf32>
    %208 = arith.addf %206, %207 : vector<20x32xf32>
    %c1_52 = arith.constant 1 : index
    %c0_53 = arith.constant 0 : index
    %c0_54 = arith.constant 0 : index
    %209 = vector.load %arg4[%c1_52, %c0_53, %c0_54] : memref<2x32x256xbf16, #tpu.memory_space<vmem>>, vector<1x32x256xbf16>
    %210 = vector.shape_cast %209 : vector<1x32x256xbf16> to vector<32x256xbf16>
    %211 = vector.extract_strided_slice %210 {offsets = [0, 0], sizes = [32, 96], strides = [1, 1]} : vector<32x256xbf16> to vector<32x96xbf16>
    %212 = vector.extract_strided_slice %210 {offsets = [0, 96], sizes = [32, 32], strides = [1, 1]} : vector<32x256xbf16> to vector<32x32xbf16>
    %213 = vector.extract_strided_slice %210 {offsets = [0, 128], sizes = [32, 128], strides = [1, 1]} : vector<32x256xbf16> to vector<32x128xbf16>
    %c1_55 = arith.constant 1 : index
    %c0_56 = arith.constant 0 : index
    %c0_57 = arith.constant 0 : index
    %214 = vector.load %arg6[%c1_55, %c0_56, %c0_57] : memref<2x8x32xf32, #tpu.memory_space<vmem>>, vector<1x8x32xf32>
    %215 = vector.shape_cast %214 : vector<1x8x32xf32> to vector<8x32xf32>
    %216 = vector.extract_strided_slice %215 {offsets = [0, 0], sizes = [1, 32], strides = [1, 1]} : vector<8x32xf32> to vector<1x32xf32>
    %217 = vector.extract_strided_slice %215 {offsets = [1, 0], sizes = [1, 32], strides = [1, 1]} : vector<8x32xf32> to vector<1x32xf32>
    %218 = vector.extract_strided_slice %215 {offsets = [2, 0], sizes = [1, 32], strides = [1, 1]} : vector<8x32xf32> to vector<1x32xf32>
    %219 = vector.extract_strided_slice %215 {offsets = [3, 0], sizes = [1, 32], strides = [1, 1]} : vector<8x32xf32> to vector<1x32xf32>
    %220 = vector.extract_strided_slice %215 {offsets = [4, 0], sizes = [1, 32], strides = [1, 1]} : vector<8x32xf32> to vector<1x32xf32>
    %221 = vector.extract_strided_slice %215 {offsets = [5, 0], sizes = [1, 32], strides = [1, 1]} : vector<8x32xf32> to vector<1x32xf32>
    %c1_58 = arith.constant 1 : index
    %c0_59 = arith.constant 0 : index
    %c0_60 = arith.constant 0 : index
    %222 = vector.load %arg7[%c1_58, %c0_59, %c0_60] : memref<2x2x128xf32, #tpu.memory_space<vmem>>, vector<1x1x96xf32>
    %223 = vector.shape_cast %222 : vector<1x1x96xf32> to vector<1x96xf32>
    %c1_61 = arith.constant 1 : index
    %c1_62 = arith.constant 1 : index
    %c0_63 = arith.constant 0 : index
    %224 = vector.load %arg7[%c1_61, %c1_62, %c0_63] : memref<2x2x128xf32, #tpu.memory_space<vmem>>, vector<1x1x128xf32>
    %225 = vector.shape_cast %224 : vector<1x1x128xf32> to vector<1x128xf32>
    %cst_64 = arith.constant dense<0.000000e+00> : vector<20xf32>
    %226 = vector.multi_reduction <add>, %208, %cst_64 [1] : vector<20x32xf32> to vector<20xf32>
    %227 = vector.shape_cast %226 : vector<20xf32> to vector<20x1xf32>
    %cst_65 = arith.constant 3.200000e+01 : f32
    %228 = vector.broadcast %cst_65 : f32 to vector<20x1xf32>
    %229 = arith.divf %227, %228 : vector<20x1xf32>
    %230 = arith.mulf %208, %208 : vector<20x32xf32>
    %cst_66 = arith.constant dense<0.000000e+00> : vector<20xf32>
    %231 = vector.multi_reduction <add>, %230, %cst_66 [1] : vector<20x32xf32> to vector<20xf32>
    %232 = vector.shape_cast %231 : vector<20xf32> to vector<20x1xf32>
    %cst_67 = arith.constant 3.200000e+01 : f32
    %233 = vector.broadcast %cst_67 : f32 to vector<20x1xf32>
    %234 = arith.divf %232, %233 : vector<20x1xf32>
    %235 = arith.mulf %229, %229 : vector<20x1xf32>
    %236 = arith.subf %234, %235 : vector<20x1xf32>
    %237 = vector.broadcast %229 : vector<20x1xf32> to vector<20x32xf32>
    %238 = arith.subf %208, %237 : vector<20x32xf32>
    %cst_68 = arith.constant 9.99999974E-6 : f32
    %239 = vector.broadcast %cst_68 : f32 to vector<20x1xf32>
    %240 = arith.addf %236, %239 : vector<20x1xf32>
    %241 = math.rsqrt %240 : vector<20x1xf32>
    %242 = vector.broadcast %241 : vector<20x1xf32> to vector<20x32xf32>
    %243 = arith.mulf %238, %242 : vector<20x32xf32>
    %244 = vector.broadcast %216 : vector<1x32xf32> to vector<20x32xf32>
    %245 = arith.mulf %243, %244 : vector<20x32xf32>
    %246 = vector.broadcast %217 : vector<1x32xf32> to vector<20x32xf32>
    %247 = arith.addf %245, %246 : vector<20x32xf32>
    %248 = arith.truncf %247 : vector<20x32xf32> to vector<20x32xbf16>
    %cst_69 = arith.constant dense<0.000000e+00> : vector<20x96xf32>
    %249 = tpu.matmul %248, %211, %cst_69 {dimension_numbers = #tpu.dot_dimension_numbers<[1], [0], [0], [1], [0, 0, 1, 1], [], []>} : vector<20x32xbf16>, vector<32x96xbf16>, vector<20x96xf32> -> vector<20x96xf32>
    %250 = vector.broadcast %223 : vector<1x96xf32> to vector<20x96xf32>
    %251 = arith.addf %249, %250 : vector<20x96xf32>
    %252 = vector.extract_strided_slice %251 {offsets = [0, 0], sizes = [20, 8], strides = [1, 1]} : vector<20x96xf32> to vector<20x8xf32>
    %253 = vector.extract_strided_slice %251 {offsets = [0, 8], sizes = [20, 8], strides = [1, 1]} : vector<20x96xf32> to vector<20x8xf32>
    %254 = vector.extract_strided_slice %251 {offsets = [0, 16], sizes = [20, 8], strides = [1, 1]} : vector<20x96xf32> to vector<20x8xf32>
    %255 = vector.extract_strided_slice %251 {offsets = [0, 24], sizes = [20, 8], strides = [1, 1]} : vector<20x96xf32> to vector<20x8xf32>
    %256 = vector.shape_cast %252 : vector<20x8xf32> to vector<1x20x8xf32>
    %257 = vector.shape_cast %253 : vector<20x8xf32> to vector<1x20x8xf32>
    %258 = vector.shape_cast %254 : vector<20x8xf32> to vector<1x20x8xf32>
    %259 = vector.shape_cast %255 : vector<20x8xf32> to vector<1x20x8xf32>
    %260 = tpu.concatenate %256, %257, %258, %259 in 0 : vector<1x20x8xf32>, vector<1x20x8xf32>, vector<1x20x8xf32>, vector<1x20x8xf32> -> vector<4x20x8xf32>
    %261 = vector.extract_strided_slice %251 {offsets = [0, 32], sizes = [20, 8], strides = [1, 1]} : vector<20x96xf32> to vector<20x8xf32>
    %262 = vector.extract_strided_slice %251 {offsets = [0, 40], sizes = [20, 8], strides = [1, 1]} : vector<20x96xf32> to vector<20x8xf32>
    %263 = vector.extract_strided_slice %251 {offsets = [0, 48], sizes = [20, 8], strides = [1, 1]} : vector<20x96xf32> to vector<20x8xf32>
    %264 = vector.extract_strided_slice %251 {offsets = [0, 56], sizes = [20, 8], strides = [1, 1]} : vector<20x96xf32> to vector<20x8xf32>
    %265 = vector.shape_cast %261 : vector<20x8xf32> to vector<1x20x8xf32>
    %266 = vector.shape_cast %262 : vector<20x8xf32> to vector<1x20x8xf32>
    %267 = vector.shape_cast %263 : vector<20x8xf32> to vector<1x20x8xf32>
    %268 = vector.shape_cast %264 : vector<20x8xf32> to vector<1x20x8xf32>
    %269 = tpu.concatenate %265, %266, %267, %268 in 0 : vector<1x20x8xf32>, vector<1x20x8xf32>, vector<1x20x8xf32>, vector<1x20x8xf32> -> vector<4x20x8xf32>
    %270 = vector.extract_strided_slice %251 {offsets = [0, 64], sizes = [20, 8], strides = [1, 1]} : vector<20x96xf32> to vector<20x8xf32>
    %271 = vector.extract_strided_slice %251 {offsets = [0, 72], sizes = [20, 8], strides = [1, 1]} : vector<20x96xf32> to vector<20x8xf32>
    %272 = vector.extract_strided_slice %251 {offsets = [0, 80], sizes = [20, 8], strides = [1, 1]} : vector<20x96xf32> to vector<20x8xf32>
    %273 = vector.extract_strided_slice %251 {offsets = [0, 88], sizes = [20, 8], strides = [1, 1]} : vector<20x96xf32> to vector<20x8xf32>
    %274 = vector.shape_cast %270 : vector<20x8xf32> to vector<1x20x8xf32>
    %275 = vector.shape_cast %271 : vector<20x8xf32> to vector<1x20x8xf32>
    %276 = vector.shape_cast %272 : vector<20x8xf32> to vector<1x20x8xf32>
    %277 = vector.shape_cast %273 : vector<20x8xf32> to vector<1x20x8xf32>
    %278 = tpu.concatenate %274, %275, %276, %277 in 0 : vector<1x20x8xf32>, vector<1x20x8xf32>, vector<1x20x8xf32>, vector<1x20x8xf32> -> vector<4x20x8xf32>
    %279 = arith.truncf %260 : vector<4x20x8xf32> to vector<4x20x8xbf16>
    %280 = arith.truncf %269 : vector<4x20x8xf32> to vector<4x20x8xbf16>
    %cst_70 = arith.constant dense<0.000000e+00> : vector<4x20x20xf32>
    %281 = tpu.matmul %279, %280, %cst_70 {dimension_numbers = #tpu.dot_dimension_numbers<[2], [2], [1], [1], [0, 0, 0, 1, 1, 1], [0], [0]>} : vector<4x20x8xbf16>, vector<4x20x8xbf16>, vector<4x20x20xf32> -> vector<4x20x20xf32>
    %cst_71 = arith.constant 0.353553385 : f32
    %282 = vector.broadcast %cst_71 : f32 to vector<4x20x20xf32>
    %283 = arith.mulf %281, %282 : vector<4x20x20xf32>
    %284 = vector.shape_cast %62 : vector<20x20xf32> to vector<1x20x20xf32>
    %285 = vector.broadcast %284 : vector<1x20x20xf32> to vector<4x20x20xf32>
    %286 = arith.addf %283, %285 : vector<4x20x20xf32>
    %cst_72 = arith.constant dense<0xFF800000> : vector<4x20xf32>
    %287 = vector.multi_reduction <maximumf>, %286, %cst_72 [2] : vector<4x20x20xf32> to vector<4x20xf32>
    %288 = vector.shape_cast %287 : vector<4x20xf32> to vector<4x20x1xf32>
    %289 = vector.broadcast %288 : vector<4x20x1xf32> to vector<4x20x20xf32>
    %290 = arith.subf %286, %289 : vector<4x20x20xf32>
    %291 = math.exp %290 : vector<4x20x20xf32>
    %cst_73 = arith.constant dense<0.000000e+00> : vector<4x20xf32>
    %292 = vector.multi_reduction <add>, %291, %cst_73 [2] : vector<4x20x20xf32> to vector<4x20xf32>
    %293 = vector.shape_cast %292 : vector<4x20xf32> to vector<4x20x1xf32>
    %294 = tpu.reciprocal %293 {approx = true} : vector<4x20x1xf32> -> vector<4x20x1xf32>
    %295 = vector.broadcast %294 : vector<4x20x1xf32> to vector<4x20x20xf32>
    %296 = arith.mulf %291, %295 : vector<4x20x20xf32>
    %297 = arith.truncf %296 : vector<4x20x20xf32> to vector<4x20x20xbf16>
    %298 = arith.truncf %278 : vector<4x20x8xf32> to vector<4x20x8xbf16>
    %cst_74 = arith.constant dense<0.000000e+00> : vector<4x20x8xf32>
    %299 = tpu.matmul %297, %298, %cst_74 {dimension_numbers = #tpu.dot_dimension_numbers<[2], [1], [1], [2], [0, 0, 0, 1, 1, 2], [0], [0]>} : vector<4x20x20xbf16>, vector<4x20x8xbf16>, vector<4x20x8xf32> -> vector<4x20x8xf32>
    %300 = vector.extract_strided_slice %299 {offsets = [0, 0, 0], sizes = [1, 20, 8], strides = [1, 1, 1]} : vector<4x20x8xf32> to vector<1x20x8xf32>
    %301 = vector.shape_cast %300 : vector<1x20x8xf32> to vector<20x8xf32>
    %302 = vector.extract_strided_slice %299 {offsets = [1, 0, 0], sizes = [1, 20, 8], strides = [1, 1, 1]} : vector<4x20x8xf32> to vector<1x20x8xf32>
    %303 = vector.shape_cast %302 : vector<1x20x8xf32> to vector<20x8xf32>
    %304 = vector.extract_strided_slice %299 {offsets = [2, 0, 0], sizes = [1, 20, 8], strides = [1, 1, 1]} : vector<4x20x8xf32> to vector<1x20x8xf32>
    %305 = vector.shape_cast %304 : vector<1x20x8xf32> to vector<20x8xf32>
    %306 = vector.extract_strided_slice %299 {offsets = [3, 0, 0], sizes = [1, 20, 8], strides = [1, 1, 1]} : vector<4x20x8xf32> to vector<1x20x8xf32>
    %307 = vector.shape_cast %306 : vector<1x20x8xf32> to vector<20x8xf32>
    %308 = tpu.concatenate %301, %303, %305, %307 in 1 : vector<20x8xf32>, vector<20x8xf32>, vector<20x8xf32>, vector<20x8xf32> -> vector<20x32xf32>
    %309 = arith.truncf %308 : vector<20x32xf32> to vector<20x32xbf16>
    %cst_75 = arith.constant dense<0.000000e+00> : vector<20x32xf32>
    %310 = tpu.matmul %309, %212, %cst_75 {dimension_numbers = #tpu.dot_dimension_numbers<[1], [0], [0], [1], [0, 0, 1, 1], [], []>} : vector<20x32xbf16>, vector<32x32xbf16>, vector<20x32xf32> -> vector<20x32xf32>
    %311 = arith.addf %208, %310 : vector<20x32xf32>
    %312 = vector.broadcast %218 : vector<1x32xf32> to vector<20x32xf32>
    %313 = arith.addf %311, %312 : vector<20x32xf32>
    %cst_76 = arith.constant dense<0.000000e+00> : vector<20xf32>
    %314 = vector.multi_reduction <add>, %313, %cst_76 [1] : vector<20x32xf32> to vector<20xf32>
    %315 = vector.shape_cast %314 : vector<20xf32> to vector<20x1xf32>
    %cst_77 = arith.constant 3.200000e+01 : f32
    %316 = vector.broadcast %cst_77 : f32 to vector<20x1xf32>
    %317 = arith.divf %315, %316 : vector<20x1xf32>
    %318 = arith.mulf %313, %313 : vector<20x32xf32>
    %cst_78 = arith.constant dense<0.000000e+00> : vector<20xf32>
    %319 = vector.multi_reduction <add>, %318, %cst_78 [1] : vector<20x32xf32> to vector<20xf32>
    %320 = vector.shape_cast %319 : vector<20xf32> to vector<20x1xf32>
    %cst_79 = arith.constant 3.200000e+01 : f32
    %321 = vector.broadcast %cst_79 : f32 to vector<20x1xf32>
    %322 = arith.divf %320, %321 : vector<20x1xf32>
    %323 = arith.mulf %317, %317 : vector<20x1xf32>
    %324 = arith.subf %322, %323 : vector<20x1xf32>
    %325 = vector.broadcast %317 : vector<20x1xf32> to vector<20x32xf32>
    %326 = arith.subf %313, %325 : vector<20x32xf32>
    %cst_80 = arith.constant 9.99999974E-6 : f32
    %327 = vector.broadcast %cst_80 : f32 to vector<20x1xf32>
    %328 = arith.addf %324, %327 : vector<20x1xf32>
    %329 = math.rsqrt %328 : vector<20x1xf32>
    %330 = vector.broadcast %329 : vector<20x1xf32> to vector<20x32xf32>
    %331 = arith.mulf %326, %330 : vector<20x32xf32>
    %332 = vector.broadcast %219 : vector<1x32xf32> to vector<20x32xf32>
    %333 = arith.mulf %331, %332 : vector<20x32xf32>
    %334 = vector.broadcast %220 : vector<1x32xf32> to vector<20x32xf32>
    %335 = arith.addf %333, %334 : vector<20x32xf32>
    %336 = arith.truncf %335 : vector<20x32xf32> to vector<20x32xbf16>
    %cst_81 = arith.constant dense<0.000000e+00> : vector<20x128xf32>
    %337 = tpu.matmul %336, %213, %cst_81 {dimension_numbers = #tpu.dot_dimension_numbers<[1], [0], [0], [1], [0, 0, 1, 1], [], []>} : vector<20x32xbf16>, vector<32x128xbf16>, vector<20x128xf32> -> vector<20x128xf32>
    %338 = vector.broadcast %225 : vector<1x128xf32> to vector<20x128xf32>
    %339 = arith.addf %337, %338 : vector<20x128xf32>
    %cst_82 = arith.constant 1.702000e+00 : f32
    %340 = vector.broadcast %cst_82 : f32 to vector<20x128xf32>
    %341 = arith.mulf %340, %339 : vector<20x128xf32>
    %342 = arith.negf %341 : vector<20x128xf32>
    %343 = math.exp %342 : vector<20x128xf32>
    %cst_83 = arith.constant 1.000000e+00 : f32
    %344 = vector.broadcast %cst_83 : f32 to vector<20x128xf32>
    %345 = arith.addf %344, %343 : vector<20x128xf32>
    %346 = arith.divf %344, %345 : vector<20x128xf32>
    %347 = arith.mulf %339, %346 : vector<20x128xf32>
    %348 = arith.truncf %347 : vector<20x128xf32> to vector<20x128xbf16>
    %c1_84 = arith.constant 1 : index
    %c0_85 = arith.constant 0 : index
    %c0_86 = arith.constant 0 : index
    %349 = vector.load %arg5[%c1_84, %c0_85, %c0_86] : memref<2x128x32xbf16, #tpu.memory_space<vmem>>, vector<1x128x32xbf16>
    %350 = vector.shape_cast %349 : vector<1x128x32xbf16> to vector<128x32xbf16>
    %cst_87 = arith.constant dense<0.000000e+00> : vector<20x32xf32>
    %351 = tpu.matmul %348, %350, %cst_87 {dimension_numbers = #tpu.dot_dimension_numbers<[1], [0], [0], [1], [0, 0, 1, 1], [], []>} : vector<20x128xbf16>, vector<128x32xbf16>, vector<20x32xf32> -> vector<20x32xf32>
    %352 = arith.addf %313, %351 : vector<20x32xf32>
    %353 = vector.broadcast %221 : vector<1x32xf32> to vector<20x32xf32>
    %354 = arith.addf %352, %353 : vector<20x32xf32>
    %c0_88 = arith.constant 0 : index
    %c0_89 = arith.constant 0 : index
    %c0_90 = arith.constant 0 : index
    %355 = vector.load %arg8[%c0_88, %c0_89, %c0_90] : memref<1x20x32xf32, #tpu.memory_space<vmem>>, vector<1x20x32xf32>
    %356 = vector.shape_cast %355 : vector<1x20x32xf32> to vector<20x32xf32>
    %357 = vector.shape_cast %354 : vector<20x32xf32> to vector<1x20x32xf32>
    tpu.vector_store %arg8[%c0_88, %c0_89, %c0_90], %357 {strides = array<i32>} : memref<1x20x32xf32, #tpu.memory_space<vmem>>, vector<1x20x32xf32>,
    return
  }
  func.func @transform_0(%arg0: i32) -> (i32, i32, i32) {
    %c0_i32 = arith.constant 0 : i32
    %c0_i32_0 = arith.constant 0 : i32
    %c0_i32_1 = arith.constant 0 : i32
    return %arg0, %c0_i32, %c0_i32_0 : i32, i32, i32
  }
  func.func @transform_1(%arg0: i32) -> (i32, i32) {
    %c0_i32 = arith.constant 0 : i32
    %c0_i32_0 = arith.constant 0 : i32
    %c0_i32_1 = arith.constant 0 : i32
    return %c0_i32, %c0_i32_0 : i32, i32
  }
  func.func @transform_2(%arg0: i32) -> (i32, i32) {
    %c0_i32 = arith.constant 0 : i32
    %c0_i32_0 = arith.constant 0 : i32
    %c0_i32_1 = arith.constant 0 : i32
    return %c0_i32, %c0_i32_0 : i32, i32
  }
  func.func @transform_3(%arg0: i32) -> (i32, i32, i32) {
    %c0_i32 = arith.constant 0 : i32
    %c0_i32_0 = arith.constant 0 : i32
    %c0_i32_1 = arith.constant 0 : i32
    %c0_i32_2 = arith.constant 0 : i32
    return %c0_i32, %c0_i32_0, %c0_i32_1 : i32, i32, i32
  }
  func.func @transform_4(%arg0: i32) -> (i32, i32, i32) {
    %c0_i32 = arith.constant 0 : i32
    %c0_i32_0 = arith.constant 0 : i32
    %c0_i32_1 = arith.constant 0 : i32
    %c0_i32_2 = arith.constant 0 : i32
    return %c0_i32, %c0_i32_0, %c0_i32_1 : i32, i32, i32
  }
  func.func @transform_5(%arg0: i32) -> (i32, i32, i32) {
    %c0_i32 = arith.constant 0 : i32
    %c0_i32_0 = arith.constant 0 : i32
    %c0_i32_1 = arith.constant 0 : i32
    %c0_i32_2 = arith.constant 0 : i32
    return %c0_i32, %c0_i32_0, %c0_i32_1 : i32, i32, i32
  }
  func.func @transform_6(%arg0: i32) -> (i32, i32, i32) {
    %c0_i32 = arith.constant 0 : i32
    %c0_i32_0 = arith.constant 0 : i32
    %c0_i32_1 = arith.constant 0 : i32
    %c0_i32_2 = arith.constant 0 : i32
    return %c0_i32, %c0_i32_0, %c0_i32_1 : i32, i32, i32
  }
  func.func @transform_7(%arg0: i32) -> (i32, i32, i32) {
    %c0_i32 = arith.constant 0 : i32
    %c0_i32_0 = arith.constant 0 : i32
    %c0_i32_1 = arith.constant 0 : i32
    return %arg0, %c0_i32, %c0_i32_0 : i32, i32, i32
  }
}

</mosaic_0001>

<bundles_post_ra>
// kernel: tile.9
= control target key start
LH: loop header
LB: loop body
LE: loop exit
PB: predicated region body
PF: predicated region fallthrough
CT: control target
= control target key end

     0   :  { %vm3_vm0 = vcmask 261120   ;;  %s60_s0 = inlined_call_operand.vmem [shape: f32[4,5,32], index: 0, kind: input, shape index: {}]   ;;  %s61_s1 = inlined_call_operand.vmem [shape: f32[20,32], index: 1, kind: output, shape index: {}]  }
   0x1   :  { %v2_v0 = vld [vmem:[%s60_s0] sm:$0x1f]   ;;  %v20_v1 = vld [vmem:[%s60_s0 + $0x8] sm:$0x1f]   ;;  %v22_v2 = vld [vmem:[%s60_s0 + $0x10] sm:$0x1f]  }
   0x2   :  { %4 = vst.msk [vmem:[%s61_s1] sm:$0x1f] %vm3_vm0, %v2_v0   ;;  %21 = vst.msk [vmem:[%s61_s1 + $0x5] sm:$0x1f] %vm3_vm0, %v20_v1   ;;  %v24_v3 = vld [vmem:[%s60_s0 + $0x18] sm:$0x1f]  }
   0x3   :  { %23 = vst.msk [vmem:[%s61_s1 + $0xa] sm:$0x1f] %vm3_vm0, %v22_v2   ;;  %25 = vst.msk [vmem:[%s61_s1 + $0xf] sm:$0x1f] %vm3_vm0, %v24_v3  }

// kernel: clip_vit_forward.1
= control target key start
LH: loop header
LB: loop body
LE: loop exit
PB: predicated region body
PF: predicated region fallthrough
CT: control target
= control target key end

     0   :  { %s3927_s24 = smov 0   ;;  %s4828_s0 = inlined_call_operand.vmem [shape: bf16[2,20,192], index: 0, kind: input, shape index: {}]   ;;  %s4829_s1 = inlined_call_operand.vmem [shape: bf16[192,32], index: 1, kind: input, shape index: {}]   ;;  %s4830_s2 = inlined_call_operand.vmem [shape: f32[22,32], index: 2, kind: input, shape index: {}]   ;;  %s4831_s3 = inlined_call_operand.vmem [shape: bf16[2,32,256], index: 3, kind: input, shape index: {}]   ;;  %s4832_s4 = inlined_call_operand.vmem [shape: bf16[2,128,32], index: 4, kind: input, shape index: {}]   ;;  %s4833_s5 = inlined_call_operand.vmem [shape: f32[2,8,32], index: 5, kind: input, shape index: {}]   ;;  %s4834_s6 = inlined_call_operand.vmem [shape: f32[2,2,128], index: 6, kind: input, shape index: {}]   ;;  %s4835_s7 = inlined_call_operand.vmem [shape: f32[2,20,32], index: 7, kind: output, shape index: {}]  }
   0x1 LB: > { %s3114_s25 = sadd.s32 4294967295, %s3874_s24   ;;  %p3118_p0 = scmp.ge.s32.totalorder %s3874_s24, 1  ;;  %s3874_s24 = sphi %s3927_s24, %s17_s24  }
   0x2   : > { %p237_p1 = scmp.lt.s32.totalorder %s3874_s24, 3 }
   0x4   : > { %p238_p2 = pnand %p3118_p0, %p237_p1 }
   0x5   : > { %p269_p3 = scmp.lt.s32.totalorder (!%p238_p2), %s3114_s25, 1  ;;  %s3877_s27 = smov (!%p238_p2), 120  }
   0x6   : > { %241 = sbr.rel (%p238_p2) target bundleno = 5087 (0x13df), region = 48  ;;  %s3878_s28 = smov (!%p238_p2), 112  }
   0x7   : > { %s3879_s29 = smov (!%p238_p2), 96   ;;  %s3880_s30 = smov (!%p238_p2), 104  }
   0x8   : > { %s3882_s8 = smov (!%p238_p2), 64   ;;  %s3883_s10 = smov (!%p238_p2), 32  }
   0x9   : > { %s3884_s11 = smov (!%p238_p2), 8   ;;  %s3885_s12 = smov (!%p238_p2), 24  }
   0xa   : > { %s3886_s13 = smov (!%p238_p2), 16  }
   0xb   : > { %v3671_v0 = vld [vmem:[%s4829_s1 + $0x38] sm:$0xff]   ;;  %v3876_v1 = vmov 0   ;;  %v3672_v2 = vld [vmem:[%s4829_s1 + $0x30] sm:$0xff]   ;;  %s4837_s25 = smov (!%p269_p3, %s3114_s25), 1  ;;  %v3673_v3 = vld [vmem:[%s4829_s1 + $0x28] sm:$0xff]   ;;  %vm397_vm0 = vcmask 523264   ;;  %v500_v50 = vlaneseq }
   0xc   : > { %404 = vmatprep.subr.bf16.mxu0 %v3876_v1  ;;  %s3591_s9 = smul.u32 24, %s4837_s25  ;;  %v3674_v4 = vld [vmem:[%s4829_s1 + $0x20] sm:$0xff]   ;;  %v3675_v5 = vld [vmem:[%s4829_s1 + $0x18] sm:$0xff]   ;;  %v3676_v7 = vld [vmem:[%s4829_s1 + $0x10] sm:$0xff]   ;;  %vm452_vm1 = vcmask 261120   ;;  %vm459_vm2 = vcmask 257024  }
   0xd   : > { %405 = vmatpush1.bf16.msra.mxu0 %v3671_v0  ;;  %v3677_v8 = vld [vmem:[%s4829_s1 + $0x8] sm:$0xff]   ;;  %v3678_v9 = vld [vmem:[%s4829_s1] sm:$0xff]   ;;  %v3679_v10 = vld [vmem:[%s4829_s1 + $0x58] sm:$0xff]   ;;  %v4009_v58 = vshrl.u32 %v500_v50, 7  ;;  %vm740_vm3 = vcmask 64512   ;;  %vm1030_vm12 = vcmask 158720  }
   0xe   : > { %406 = vmatprep.subr.bf16.mxu0 %v3876_v1  ;;  %s273_s14 = scalar_lea.vmem %s4828_s0, %s3591_s9  ;;  %v3680_v11 = vld [vmem:[%s4829_s1 + $0x50] sm:$0xff]   ;;  %v3681_v12 = vld [vmem:[%s4829_s1 + $0x48] sm:$0xff]   ;;  %v3682_v13 = vld [vmem:[%s4829_s1 + $0x40] sm:$0xff]   ;;  %vm1023_vm14 = vcmask 162816   ;;  %vm1176_vm15 = vcmask 1041408  }
   0xf   : > { %v3685_v6 = vld [vmem:[%s273_s14 + $0x4] ss:$8 sps:$4 sm:$0xff]   ;;  %v282_v14 = vld [vmem:[%s273_s14 + $0x10] sm:$0x33]  ;;  %v3683_v15 = vld [vmem:[%s273_s14] ss:$8 sps:$4 sm:$0xff]  }
  0x10   : > { %3137 = vmatprep.mubr.msk.bf16.mxu0 %vm397_vm0, %v3685_v6  ;;  %v3124_v16 = vcombine.high %v282_v14, %v282_v14  ;;  %v3123_v17 = vcombine.low %v282_v14, %v282_v14  ;;  %v307_v18 = vld [vmem:[%s4830_s2] sm:$0xff]  ;;  %v308_v22 = vld [vmem:[%s4830_s2 + $0x8] sm:$0xff]  ;;  %v309_v29 = vld [vmem:[%s4830_s2 + $0x10] sm:$0x3f]  ;;  %v4012_v63 = vsub.s32 4, %v4009_v58  ;;  %vm520_vm8 = vcmp.ge.s32.totalorder %v4009_v58, 5 }
  0x11   : > { %407 = vmatpush1.bf16.msra.mxu0 %v3672_v2  ;;  %v4015_v2 = vsub.s32 5, %v4009_v58 }
  0x12   : > { %408 = vmatprep.subr.bf16.mxu0 %v3876_v1 }
  0x13   : > { %v510_v6 = vrot.slane %v309_v29, %v4015_v2 }
  0x15   : > { %409 = vmatpush1.bf16.msra.mxu0 %v3673_v3  ;;  %v503_v3 = vrot.slane %v309_v29, %v4012_v63 }
  0x16   : > { %410 = vmatprep.subr.bf16.mxu0 %v3876_v1 }
  0x19   : > { %411 = vmatpush1.bf16.msra.mxu0 %v3674_v4 }
  0x1a   : > { %412 = vmatprep.subr.bf16.mxu0 %v3876_v1 }
  0x1d   : > { %413 = vmatpush1.bf16.msra.mxu0 %v3675_v5 }
  0x1e   : > { %414 = vmatprep.subr.bf16.mxu0 %v3876_v1 }
  0x21   : > { %415 = vmatpush1.bf16.msra.mxu0 %v3676_v7 }
  0x22   : > { %416 = vmatprep.subr.bf16.mxu0 %v3876_v1 }
  0x25   : > { %417 = vmatpush1.bf16.msra.mxu0 %v3677_v8 }
  0x26   : > { %418 = vmatprep.subr.bf16.mxu0 %v3876_v1 }
  0x29   : > { %419 = vmatpush1.bf16.msra.mxu0 %v3678_v9 }
  0x2a   : > { %428 = vmatprep.subr.bf16.mxu0 %v3876_v1 }
  0x2d   : > { %429 = vmatpush2.bf16.msra.mxu0 %v3679_v10 }
  0x2e   : > { %430 = vmatprep.subr.bf16.mxu0 %v3876_v1 }
  0x31   : > { %431 = vmatpush2.bf16.msra.mxu0 %v3680_v11 }
  0x32   : > { %432 = vmatprep.subr.bf16.mxu0 %v3876_v1 }
  0x35   : > { %433 = vmatpush2.bf16.msra.mxu0 %v3681_v12 }
  0x36   : > { %434 = vmatprep.subr.bf16.mxu0 %v3876_v1 }
  0x39   : > { %435 = vmatpush2.bf16.msra.mxu0 %v3682_v13 }
  0x3c   : > { %437 = vmatmul.mubr.bf16.vlgmr.msra.gmra.mxu0 %v3683_v15 }
  0x3d   : > { %3138 = vmatprep.mubr.msk.bf16.mxu0 %vm397_vm0, %v3124_v16  ;;  %vm1453_vm0 = vcmask 130048  }
  0x44   : > { %445 = vmatmul.mubr.bf16.gmra.mxu0 %v3123_v17 }
  0xfc   : > { %v438_v19 = vpop.f32.mrf.mxu0 }
  0xfd   : > { %v439_v20 = vadd.f32 %v438_v19, %v307_v18 }
  0xfe   : > { %v440_v21 = vpop.f32.mrf.mxu0 }
  0xff   : > { %v453_v23 = vsel %vm452_vm1, %v439_v20, 0.0  ;;  %v467_v24 = vmul.f32 %v439_v20, %v439_v20 }
 0x100   : > { %v441_v25 = vpop.f32.mrf.mxu0  ;;  %454 = vadd.xlane.f32.xlu0 %v453_v23 }
 0x101   : > { %v442_v26 = vadd.f32 %v441_v25, %v308_v22  ;;  %v470_v27 = vsel %vm452_vm1, %v467_v24, 0.0 }
 0x102   : > { %v443_v28 = vpop.f32.mrf.mxu0  ;;  %471 = vadd.xlane.f32.xlu1 %v470_v27 }
 0x103   : > { %v456_v30 = vsel %vm452_vm1, %v442_v26, 0.0  ;;  %v468_v31 = vmul.f32 %v442_v26, %v442_v26 }
 0x104   : > { %v446_v32 = vpop.f32.mrf.mxu0  ;;  %457 = vadd.xlane.f32.xlu0 %v456_v30  ;;  %v4048_v30 = vld [vmem:[%s4831_s3] ss:$8 sps:$4 sm:$0xff]  }
 0x105   : > { %v447_v33 = vadd.f32 %v446_v32, %v309_v29  ;;  %v473_v36 = vsel %vm452_vm1, %v468_v31, 0.0  ;;  %v4043_v29 = vld [vmem:[%s4831_s3 + $0x10] ss:$8 sps:$4 sm:$0xff]  }
 0x106   : > { %v448_v34 = vpop.f32.mrf.mxu0  ;;  %3351 = vmatprep.subr.bf16.mxu1 %v4043_v29 }
 0x107   : > { %v460_v35 = vsel %vm459_vm2, %v447_v33, 0.0  ;;  %v469_v37 = vmul.f32 %v447_v33, %v447_v33  ;;  %3352 = vmatpush3.bf16.msra.mxu1 %v4043_v29 }
 0x108   : > { %v449_v38 = vpop.f32.mrf.mxu0  ;;  %461 = vadd.xlane.f32.xlu1 %v460_v35  ;;  %474 = vadd.xlane.f32.xlu0 %v473_v36 }
 0x109   : > { %v476_v40 = vsel %vm459_vm2, %v469_v37, 0.0  ;;  %3353 = vmatprep.subr.bf16.mxu1 %v4048_v30 }
 0x10a   : > { %v450_v39 = vpop.f32.mrf.mxu0 }
 0x10b   : > { %3354 = vmatpush3.bf16.msra.mxu1 %v4048_v30 }
 0x10c   : > { %477 = vadd.xlane.f32.xlu1 %v476_v40 }
 0x189   : > { %v455_v41 = vpop.xlane.xlu0 %454 }
 0x18a   : > { %v464_v42 = vmul.f32 0.03125, %v455_v41 }
 0x18b   : > { %v472_v43 = vpop.xlane.xlu1 %471 }
 0x18c   : > { %v482_v44 = vmul.f32 %v464_v42, %v464_v42  ;;  %v479_v45 = vmul.f32 0.03125, %v472_v43  ;;  %v488_v4 = vsub.f32 %v439_v20, %v464_v42 }
 0x18d   : > { %v458_v46 = vpop.xlane.xlu0 %457 }
 0x18e   : > { %v485_v47 = vsub.f32 %v479_v45, %v482_v44  ;;  %v465_v48 = vmul.f32 0.03125, %v458_v46 }
 0x190   : > { %v491_v49 = vadd.f32 1e-05, %v485_v47  ;;  %v483_v53 = vmul.f32 %v465_v48, %v465_v48  ;;  %v489_v9 = vsub.f32 %v442_v26, %v465_v48 }
 0x191   : > { %v462_v51 = vpop.xlane.xlu1 %461  ;;  %v475_v52 = vpop.xlane.xlu0 %474 }
 0x192   : > { %3716 = vrsqrt.f32 %v491_v49  ;;  %v466_v54 = vmul.f32 0.03125, %v462_v51  ;;  %v480_v55 = vmul.f32 0.03125, %v475_v52 }
 0x194   : > { %v486_v56 = vsub.f32 %v480_v55, %v483_v53  ;;  %v484_v59 = vmul.f32 %v466_v54, %v466_v54  ;;  %v490_v15 = vsub.f32 %v447_v33, %v466_v54  ;;  %v612_v53 = vsub.s32 0, %v4009_v58  ;;  %v4058_v55 = vld [vmem:[%s4833_s5] sm:$0xff] }
 0x195   : > { %v478_v57 = vpop.xlane.xlu1 %477 }
 0x196   : > { %v492_v60 = vadd.f32 1e-05, %v486_v56  ;;  %v481_v61 = vmul.f32 0.03125, %v478_v57 }
 0x198   : > { %3718 = vrsqrt.f32 %v492_v60  ;;  %v487_v62 = vsub.f32 %v481_v61, %v484_v59  ;;  %v613_v60 = vrot.slane %v4058_v55, %v612_v53  ;;  %v619_v61 = vsub.s32 1, %v4009_v58 }
 0x19a   : > { %v493_v0 = vadd.f32 1e-05, %v487_v62 }
 0x19c   : > { %3720 = vrsqrt.f32 %v493_v0 }
 0x19f   : > { %v3717_v5 = vpop.eup %3716 }
 0x1a0   : > { %v497_v7 = vmul.f32 %v3717_v5, %v488_v4 }
 0x1a2   : > { %v504_v8 = vmul.f32 %v503_v3, %v497_v7  ;;  %v620_v7 = vrot.slane %v4058_v55, %v619_v61 }
 0x1a4   : > { %v4019_v10 = vadd.f32 %v510_v6, %v504_v8 }
 0x1a5   : > { %v3719_v11 = vpop.eup %3718 }
 0x1a6   : > { %v565_v12 = vsel %vm452_vm1, %v4019_v10, 0.0  ;;  %v577_v13 = vmul.f32 %v4019_v10, %v4019_v10  ;;  %v498_v14 = vmul.f32 %v3719_v11, %v489_v9 }
 0x1a7   : > { %566 = vadd.xlane.f32.xlu0 %v565_v12 }
 0x1a8   : > { %v580_v16 = vsel %vm452_vm1, %v577_v13, 0.0  ;;  %v505_v17 = vmul.f32 %v503_v3, %v498_v14 }
 0x1a9   : > { %v3721_v18 = vpop.eup %3720  ;;  %581 = vadd.xlane.f32.xlu1 %v580_v16  ;;  %v3140_v16 = vld [vmem:[%s4834_s6] ss:$0 sm:$0xff] }
 0x1aa   : > { %v4026_v19 = vadd.f32 %v510_v6, %v505_v17  ;;  %v499_v20 = vmul.f32 %v3721_v18, %v490_v15 }
 0x1ac   : > { %v568_v21 = vsel %vm452_vm1, %v4026_v19, 0.0  ;;  %v506_v22 = vmul.f32 %v503_v3, %v499_v20  ;;  %v578_v26 = vmul.f32 %v4026_v19, %v4026_v19 }
 0x1ad   : > { %569 = vadd.xlane.f32.xlu1 %v568_v21 }
 0x1ae   : > { %v4030_v23 = vadd.f32 %v510_v6, %v506_v22  ;;  %v583_v28 = vsel %vm452_vm1, %v578_v26, 0.0 }
 0x1b0   : > { %v571_v24 = vsel %vm459_vm2, %v4030_v23, 0.0  ;;  %v579_v25 = vmul.f32 %v4030_v23, %v4030_v23 }
 0x1b1   : > { %572 = vadd.xlane.f32.xlu0 %v571_v24 }
 0x1b2   : > { %v586_v27 = vsel %vm459_vm2, %v579_v25, 0.0 }
 0x1b3   : > { %587 = vadd.xlane.f32.xlu1 %v586_v27 }
 0x1b5   : > { %584 = vadd.xlane.f32.xlu0 %v583_v28 }
 0x230   : > { %v567_v31 = vpop.xlane.xlu0 %566 }
 0x231   : > { %v574_v32 = vmul.f32 0.03125, %v567_v31 }
 0x232   : > { %v582_v33 = vpop.xlane.xlu1 %581 }
 0x233   : > { %v592_v34 = vmul.f32 %v574_v32, %v574_v32  ;;  %v589_v35 = vmul.f32 0.03125, %v582_v33  ;;  %v598_v56 = vsub.f32 %v4019_v10, %v574_v32 }
 0x235   : > { %v595_v36 = vsub.f32 %v589_v35, %v592_v34 }
 0x236   : > { %v570_v37 = vpop.xlane.xlu1 %569 }
 0x237   : > { %v601_v39 = vadd.f32 1e-05, %v595_v36  ;;  %v575_v40 = vmul.f32 0.03125, %v570_v37 }
 0x239   : > { %3722 = vrsqrt.f32 %v601_v39  ;;  %v593_v46 = vmul.f32 %v575_v40, %v575_v40  ;;  %v599_v0 = vsub.f32 %v4026_v19, %v575_v40 }
 0x23a   : > { %v573_v38 = vpop.xlane.xlu0 %572 }
 0x23b   : > { %v576_v41 = vmul.f32 0.03125, %v573_v38 }
 0x23c   : > { %v588_v42 = vpop.xlane.xlu1 %587 }
 0x23d   : > { %v594_v43 = vmul.f32 %v576_v41, %v576_v41  ;;  %v591_v44 = vmul.f32 0.03125, %v588_v42  ;;  %v600_v57 = vsub.f32 %v4030_v23, %v576_v41 }
 0x23e   : > { %v585_v45 = vpop.xlane.xlu0 %584 }
 0x23f   : > { %v597_v47 = vsub.f32 %v591_v44, %v594_v43  ;;  %v590_v48 = vmul.f32 0.03125, %v585_v45 }
 0x241   : > { %v603_v49 = vadd.f32 1e-05, %v597_v47  ;;  %v596_v51 = vsub.f32 %v590_v48, %v593_v46 }
 0x243   : > { %3724 = vrsqrt.f32 %v603_v49  ;;  %v602_v52 = vadd.f32 1e-05, %v596_v51 }
 0x245   : > { %3726 = vrsqrt.f32 %v602_v52 }
 0x246   : > { %v3723_v54 = vpop.eup %3722 }
 0x247   : > { %v607_v59 = vmul.f32 %v3723_v54, %v598_v56 }
 0x249   : > { %v614_v6 = vmul.f32 %v613_v60, %v607_v59 }
 0x24b   : > { %v621_v12 = vadd.f32 %v620_v7, %v614_v6 }
 0x250   : > { %v3725_v62 = vpop.eup %3724 }
 0x251   : > { %v609_v3 = vmul.f32 %v3725_v62, %v600_v57 }
 0x252   : > { %v3727_v4 = vpop.eup %3726 }
 0x253   : > { %v608_v5 = vmul.f32 %v3727_v4, %v599_v0  ;;  %v616_v8 = vmul.f32 %v613_v60, %v609_v3 }
 0x255   : > { %v615_v9 = vmul.f32 %v613_v60, %v608_v5  ;;  %v623_v11 = vadd.f32 %v620_v7, %v616_v8 }
 0x257   : > { %v622_v13 = vadd.f32 %v620_v7, %v615_v9  ;;  %v625_v15 = vpack.c.bf16 %v623_v11, %v623_v11  ;;  %v519_v9 = vand.u32 127, %v500_v50  ;;  %v516_v11 = vadd.s32 8, %v4009_v58 }
 0x259   : > { %v624_v14 = vpack.c.bf16 %v622_v13, %v621_v12  ;;  %vm526_vm4 = vcmp.ge.s32.totalorder %v519_v9, 5  ;;  %vm537_vm5 = vcmp.ge.s32.totalorder %v519_v9, 10  ;;  %vm549_vm6 = vcmp.ge.s32.totalorder %v519_v9, 15 }
 0x25a   : > { %v527_v12 = vsel %vm526_vm4, 1, %v3876_v1  ;;  %v538_v13 = vsel %vm537_vm5, 1, %v3876_v1  ;;  %vm529_vm7 = vcmp.ge.s32.totalorder %v516_v11, 10  ;;  %vm541_vm9 = vcmp.ge.s32.totalorder %v516_v11, 15 }
 0x25b   : > { %3355 = vmatprep.mubr.msk.bf16.mxu1 %vm452_vm1, %v624_v14  ;;  %v539_v14 = vadd.s32 %v538_v13, %v527_v12  ;;  %vm1457_vm4 = vcmask 195584  }
 0x25c   : > { %3356 = vmatmul.mubr.msk.bf16.vlgmr.msra.gmra.mxu1 %vm452_vm1, %v625_v15  ;;  %v550_v15 = vsel %vm549_vm6, 1, %v3876_v1 }
 0x31c   : > { %v3357_v17 = vpop.f32.mrf.mxu1 }
 0x31d   : > { %v691_v18 = vadd.f32 %v3357_v17, %v3140_v16  ;;  %v551_v17 = vadd.s32 %v550_v15, %v539_v14 }
 0x31e   : > { %v682_v20 = vpop.f32.mrf.mxu1 }
 0x31f   : > { %703 = vrot.lane.b32.xlu0 %v691_v18, %s3877_s27  ;;  %v683_v24 = vadd.f32 %v3140_v16, %v682_v20  ;;  %v4082_v28 = vpack.c.bf16 %v691_v18, %v691_v18  ;;  %v544_v20 = vsel %vm541_vm9, 1, %v3876_v1  ;;  %vm3139_vm10 = vcmp.eq.s32.totalorder %v551_v17, 3 }
 0x320   : > { %v3358_v21 = vpop.f32.mrf.mxu1 }
 0x322   : > { %v685_v22 = vpop.f32.mrf.mxu1 }
 0x323   : > { %v686_v25 = vadd.f32 %v3140_v16, %v685_v22  ;;  %v532_v16 = vsel %vm529_vm7, 1, %v3876_v1 }
 0x324   : > { %v535_v50 = vadd.s32 1, %v532_v16 }
 0x325   : > { %v3616_v26 = vpack.i.bf16 %v686_v25, %v683_v24  ;;  %v4076_v27 = vpack.c.bf16 %v686_v25, %v683_v24  ;;  %v3881_v24 = vmov -1e+30  }
 0x326   : > { %v547_v21 = vadd.s32 %v544_v20, %v535_v50  ;;  %v4154_v25 = vsel %vm3139_vm10, 0.0, %v3881_v24 }
 0x327   : > { %3617 = vrot.lane.b32.xlu0 %v3616_v26, %s3878_s28  ;;  %3612 = vrot.lane.b32.xlu1 %v3616_v26, %s3877_s27 }
 0x328   : > { %3363 = vmatprep.mubr.msk.bf16.mxu1 %vm740_vm3, %v4076_v27  ;;  %vm553_vm13 = vcmp.eq.s32.totalorder %v547_v21, %v551_v17 }
 0x32b   : > { %738 = vrot.lane.b32.xlu0 %v4082_v28, %s3879_s29  ;;  %712 = vrot.lane.b32.xlu1 %v691_v18, %s3878_s28 }
 0x32f   : > { %721 = vrot.lane.b32.xlu1 %v691_v18, %s3880_s30  ;;  %v523_v18 = vsel %vm520_vm8, 1, %v3876_v1 }
 0x330   : > { %vm552_vm11 = vcmp.eq.s32.totalorder %v523_v18, %v551_v17 }
 0x333   : > { %3622 = vrot.lane.b32.xlu1 %v3616_v26, %s3880_s30 }
 0x337   : > { %736 = vrot.lane.b32.xlu1 %v4076_v27, %s3879_s29 }
 0x391   : > { %v704_v31 = vpop.permute.xlu0 %703 }
 0x392   : > { %v4091_v32 = vpack.c.bf16 %v704_v31, %v704_v31 }
 0x394   : > { %805 = vrot.lane.b32.xlu0 %v4091_v32, %s3879_s29 }
 0x399   : > { %v3618_v33 = vpop.permute.xlu0 %3617  ;;  %v3613_v34 = vpop.permute.xlu1 %3612 }
 0x39a   : > { %v3615_v35 = vunpack.i.h.bf16 %v3613_v34  ;;  %v3614_v36 = vunpack.i.l.bf16 %v3613_v34  ;;  %v3620_v40 = vunpack.i.h.bf16 %v3618_v33  ;;  %v3619_v41 = vunpack.i.l.bf16 %v3618_v33 }
 0x39b   : > { %v4156_v33 = vsel %vm552_vm11, 0.0, %v3881_v24 }
 0x39c   : > { %v4095_v37 = vpack.c.bf16 %v3615_v35, %v3614_v36  ;;  %v4107_v46 = vpack.c.bf16 %v3620_v40, %v3619_v41  ;;  %v4166_v40 = vsel %vm553_vm13, 0.0, %v3881_v24 }
 0x39d   : > { %v739_v38 = vpop.permute.xlu0 %738  ;;  %v713_v39 = vpop.permute.xlu1 %712 }
 0x39e   : > { %v4097_v42 = vpack.c.bf16 %v713_v39, %v713_v39  ;;  %3567 = vmatprep.subr.msk.bf16.mxu1 %vm740_vm3, %v739_v38  ;;  %803 = vrot.lane.b32.xlu1 %v4095_v37, %s3879_s29  ;;  %v751_v43 = vsel %vm740_vm3, %v739_v38, 0 }
 0x39f   : > { %3360 = vmatpush3.bf16.xpose.msra.mxu1 %v751_v43 }
 0x3a0   : > { %871 = vrot.lane.b32.xlu0 %v4097_v42, %s3879_s29 }
 0x3a1   : > { %v722_v44 = vpop.permute.xlu1 %721 }
 0x3a2   : > { %v4105_v45 = vpack.c.bf16 %v722_v44, %v722_v44 }
 0x3a4   : > { %869 = vrot.lane.b32.xlu0 %v4107_v46, %s3879_s29  ;;  %937 = vrot.lane.b32.xlu1 %v4105_v45, %s3879_s29 }
 0x3a5   : > { %v3623_v47 = vpop.permute.xlu1 %3622 }
 0x3a6   : > { %v3625_v48 = vunpack.i.h.bf16 %v3623_v47  ;;  %v3624_v49 = vunpack.i.l.bf16 %v3623_v47 }
 0x3a8   : > { %v4113_v51 = vpack.c.bf16 %v3625_v48, %v3624_v49 }
 0x3a9   : > { %v737_v52 = vpop.permute.xlu1 %736 }
 0x3aa   : > { %3387 = vmatprep.mubr.msk.bf16.mxu0 %vm740_vm3, %v4113_v51  ;;  %935 = vrot.lane.b32.xlu1 %v4113_v51, %s3879_s29  ;;  %v748_v54 = vsel %vm740_vm3, %v737_v52, 0 }
 0x3ab   : > { %3568 = vmatprep.subr.msk.bf16.mxu1 %vm740_vm3, %v737_v52 }
 0x3ac   : > { %3362 = vmatpush3.bf16.xpose.msra.mxu1 %v748_v54 }
 0x3b3   : > { %3364 = vmatmul.mubr.msk.bf16.vlgmr.msra.gmra.mxu1 %vm740_vm3, %v4082_v28 }
 0x3b4   : > { %3371 = vmatprep.mubr.msk.bf16.mxu1 %vm740_vm3, %v4095_v37 }
 0x406   : > { %v806_v56 = vpop.permute.xlu0 %805 }
 0x407   : > { %3569 = vmatprep.subr.msk.bf16.mxu1 %vm740_vm3, %v806_v56  ;;  %v817_v57 = vsel %vm740_vm3, %v806_v56, 0 }
 0x408   : > { %3368 = vmatpush3.bf16.xpose.msra.mxu1 %v817_v57 }
 0x410   : > { %v804_v59 = vpop.permute.xlu1 %803 }
 0x411   : > { %3570 = vmatprep.subr.msk.bf16.mxu1 %vm740_vm3, %v804_v59  ;;  %v814_v60 = vsel %vm740_vm3, %v804_v59, 0 }
 0x412   : > { %v872_v62 = vpop.permute.xlu0 %871  ;;  %3370 = vmatpush3.bf16.xpose.msra.mxu1 %v814_v60 }
 0x413   : > { %3571 = vmatprep.subr.msk.bf16.mxu1 %vm740_vm3, %v872_v62  ;;  %v883_v4 = vsel %vm740_vm3, %v872_v62, 0 }
 0x416   : > { %v938_v0 = vpop.permute.xlu1 %937  ;;  %v870_v5 = vpop.permute.xlu0 %869 }
 0x417   : > { %3573 = vmatprep.subr.msk.bf16.mxu0 %vm740_vm3, %v938_v0  ;;  %v949_v3 = vsel %vm740_vm3, %v938_v0, 0  ;;  %v880_v8 = vsel %vm740_vm3, %v870_v5, 0 }
 0x418   : > { %3384 = vmatpush3.bf16.xpose.msra.mxu0 %v949_v3 }
 0x419   : > { %3372 = vmatmul.mubr.msk.bf16.vlgmr.msra.gmra.mxu1 %vm740_vm3, %v4091_v32 }
 0x41a   : > { %3376 = vmatpush3.bf16.xpose.msra.mxu1 %v883_v4  ;;  %3379 = vmatprep.mubr.msk.bf16.mxu1 %vm740_vm3, %v4107_v46 }
 0x41b   : > { %3572 = vmatprep.subr.msk.bf16.mxu1 %vm740_vm3, %v870_v5 }
 0x41c   : > { %v936_v6 = vpop.permute.xlu1 %935 }
 0x41d   : > { %3574 = vmatprep.subr.msk.bf16.mxu0 %vm740_vm3, %v936_v6  ;;  %v946_v7 = vsel %vm740_vm3, %v936_v6, 0 }
 0x420   : > { %3386 = vmatpush3.bf16.xpose.msra.mxu0 %v946_v7 }
 0x422   : > { %3378 = vmatpush3.bf16.xpose.msra.mxu1 %v880_v8 }
 0x427   : > { %3388 = vmatmul.mubr.msk.bf16.vlgmr.msra.gmra.mxu0 %vm740_vm3, %v4105_v45 }
 0x429   : > { %3380 = vmatmul.mubr.msk.bf16.vlgmr.msra.gmra.mxu1 %vm740_vm3, %v4097_v42 }
 0x473   : > { %v3365_v22 = vpop.f32.mrf.mxu1 }
 0x474   : > { %v1001_v26 = vmul.f32 0.35355338, %v3365_v22 }
 0x475   : > { %v787_v31 = vpop.f32.mrf.mxu1 }
 0x476   : > { %v999_v34 = vmul.f32 0.35355338, %v787_v31  ;;  %v4159_v35 = vadd.f32 %v1001_v26, %v4154_v25 }
 0x477   : > { %v3366_v36 = vpop.f32.mrf.mxu1 }
 0x478   : > { %v1031_v1 = vsel %vm1030_vm12, %v4159_v35, -inf  ;;  %v4164_v38 = vadd.f32 %v999_v34, %v4156_v33 }
 0x479   : > { %1032 = vmax.xlane.f32.xlu0 %v1031_v1  ;;  %v790_v39 = vpop.f32.mrf.mxu1 }
 0x47a   : > { %v1000_v41 = vmul.f32 0.35355338, %v790_v39  ;;  %v1024_v43 = vsel %vm1023_vm14, %v4164_v38, -inf }
 0x47c   : > { %v4171_v44 = vadd.f32 %v1000_v41, %v4166_v40 }
 0x47d   : > { %1025 = vmax.xlane.f32.xlu0 %v1024_v43 }
 0x47e   : > { %v1027_v47 = vsel %vm1023_vm14, %v4171_v44, -inf }
 0x47f   : > { %1028 = vmax.xlane.f32.xlu1 %v1027_v47 }
 0x4d9   : > { %v3373_v48 = vpop.f32.mrf.mxu1 }
 0x4da   : > { %v1004_v49 = vmul.f32 0.35355338, %v3373_v48 }
 0x4db   : > { %v853_v52 = vpop.f32.mrf.mxu1 }
 0x4dc   : > { %v1002_v54 = vmul.f32 0.35355338, %v853_v52  ;;  %v4176_v56 = vadd.f32 %v1004_v49, %v4154_v25 }
 0x4dd   : > { %v3374_v57 = vpop.f32.mrf.mxu1 }
 0x4de   : > { %v1040_v59 = vsel %vm1030_vm12, %v4176_v56, -inf  ;;  %v4181_v60 = vadd.f32 %v1002_v54, %v4156_v33 }
 0x4df   : > { %1041 = vmax.xlane.f32.xlu1 %v1040_v59  ;;  %v856_v62 = vpop.f32.mrf.mxu1 }
 0x4e0   : > { %v1003_v0 = vmul.f32 0.35355338, %v856_v62  ;;  %v1034_v3 = vsel %vm1023_vm14, %v4181_v60, -inf }
 0x4e1   : > { %1035 = vmax.xlane.f32.xlu0 %v1034_v3 }
 0x4e2   : > { %v4186_v4 = vadd.f32 %v1003_v0, %v4166_v40 }
 0x4e4   : > { %v1037_v5 = vsel %vm1023_vm14, %v4186_v4, -inf }
 0x4e5   : > { %1038 = vmax.xlane.f32.xlu0 %v1037_v5 }
 0x4e7   : > { %v3389_v6 = vpop.f32.mrf.mxu0 }
 0x4e8   : > { %v1010_v7 = vmul.f32 0.35355338, %v3389_v6 }
 0x4e9   : > { %v3381_v8 = vpop.f32.mrf.mxu1  ;;  %v985_v9 = vpop.f32.mrf.mxu0 }
 0x4ea   : > { %v1007_v11 = vmul.f32 0.35355338, %v3381_v8  ;;  %v1008_v12 = vmul.f32 0.35355338, %v985_v9  ;;  %v4197_v20 = vadd.f32 %v1010_v7, %v4154_v25 }
 0x4eb   : > { %v919_v13 = vpop.f32.mrf.mxu1  ;;  %v3390_v14 = vpop.f32.mrf.mxu0 }
 0x4ec   : > { %v1005_v15 = vmul.f32 0.35355338, %v919_v13  ;;  %v4191_v16 = vadd.f32 %v1008_v12, %v4156_v33  ;;  %v4194_v17 = vadd.f32 %v1007_v11, %v4154_v25  ;;  %v1058_v31 = vsel %vm1030_vm12, %v4197_v20, -inf }
 0x4ed   : > { %v3382_v50 = vpop.f32.mrf.mxu1  ;;  %v988_v18 = vpop.f32.mrf.mxu0 }
 0x4ee   : > { %v1009_v21 = vmul.f32 0.35355338, %v988_v18  ;;  %v1052_v22 = vsel %vm1023_vm14, %v4191_v16, -inf  ;;  %v1049_v24 = vsel %vm1030_vm12, %v4194_v17, -inf  ;;  %v4204_v26 = vadd.f32 %v1005_v15, %v4156_v33 }
 0x4ef   : > { %1053 = vmax.xlane.f32.xlu1 %v1052_v22  ;;  %1050 = vmax.xlane.f32.xlu0 %v1049_v24  ;;  %v922_v49 = vpop.f32.mrf.mxu1 }
 0x4f0   : > { %v1043_v34 = vsel %vm1023_vm14, %v4204_v26, -inf  ;;  %v4211_v36 = vadd.f32 %v1009_v21, %v4166_v40  ;;  %v1006_v52 = vmul.f32 0.35355338, %v922_v49 }
 0x4f2   : > { %v1055_v1 = vsel %vm1023_vm14, %v4211_v36, -inf }
 0x4f3   : > { %1059 = vmax.xlane.f32.xlu1 %v1058_v31  ;;  %1044 = vmax.xlane.f32.xlu0 %v1043_v34 }
 0x4f7   : > { %1056 = vmax.xlane.f32.xlu0 %v1055_v1 }
 0x502   : > { %v1033_v39 = vpop.xlane.xlu0 %1032 }
 0x503   : > { %v1063_v41 = vsub.f32 %v4159_v35, %v1033_v39 }
 0x504   : > { %1230 = vrot.lane.b32.xlu1 %v4091_v32, %s3882_s8  ;;  %v4224_v32 = vadd.f32 %v1006_v52, %v4166_v40 }
 0x505   : > { %v1077_v47 = vmul.f32 1.442695, %v1063_v41 }
 0x506   : > { %v1026_v43 = vpop.xlane.xlu0 %1025 }
 0x507   : > { %v1061_v48 = vsub.f32 %v4164_v38, %v1026_v43  ;;  %3728 = vpow2.f32 %v1077_v47 }
 0x508   : > { %v1029_v59 = vpop.xlane.xlu1 %1028 }
 0x509   : > { %v1073_v54 = vmul.f32 1.442695, %v1061_v48  ;;  %v1062_v62 = vsub.f32 %v4171_v44, %v1029_v59 }
 0x50b   : > { %3730 = vpow2.f32 %v1073_v54  ;;  %v1075_v0 = vmul.f32 1.442695, %v1062_v62 }
 0x50d   : > { %1167 = vrot.lane.b32.xlu0 %v4082_v28, %s3882_s8  ;;  %v1046_v28 = vsel %vm1023_vm14, %v4224_v32, -inf  ;;  %3732 = vpow2.f32 %v1075_v0 }
 0x511   : > { %1292 = vrot.lane.b32.xlu0 %v4097_v42, %s3882_s8 }
 0x514   : > { %v4228_v42 = vpop.eup %3728 }
 0x515   : > { %v1103_v35 = vsel %vm1030_vm12, %v4228_v42, 0.0 }
 0x518   : > { %v4232_v57 = vpop.eup %3730 }
 0x519   : > { %v1097_v38 = vsel %vm1023_vm14, %v4232_v57, 0.0 }
 0x51a   : > { %v4243_v3 = vpop.eup %3732 }
 0x51b   : > { %v1100_v5 = vsel %vm1023_vm14, %v4243_v3, 0.0 }
 0x528   : > { %1047 = vmax.xlane.f32.xlu1 %v1046_v28 }
 0x530   : > { %1104 = vadd.xlane.f32.xlu0 %v1103_v35 }
 0x534   : > { %1098 = vadd.xlane.f32.xlu0 %v1097_v38 }
 0x539   : > { %1165 = vrot.lane.b32.xlu1 %v4076_v27, %s3882_s8 }
 0x53d   : > { %1228 = vrot.lane.b32.xlu1 %v4095_v37, %s3882_s8 }
 0x541   : > { %1354 = vrot.lane.b32.xlu1 %v4105_v45, %s3882_s8 }
 0x565   : > { %1101 = vadd.xlane.f32.xlu1 %v1100_v5 }
 0x568   : > { %v1042_v6 = vpop.xlane.xlu1 %1041 }
 0x569   : > { %v1066_v27 = vsub.f32 %v4176_v56, %v1042_v6 }
 0x56a   : > { %v1036_v7 = vpop.xlane.xlu0 %1035 }
 0x56b   : > { %v1083_v8 = vmul.f32 1.442695, %v1066_v27  ;;  %v1064_v13 = vsub.f32 %v4181_v60, %v1036_v7 }
 0x56d   : > { %3734 = vpow2.f32 %v1083_v8 }
 0x56e   : > { %v1039_v37 = vpop.xlane.xlu0 %1038 }
 0x56f   : > { %v1065_v45 = vsub.f32 %v4186_v4, %v1039_v37  ;;  %v1079_v4 = vmul.f32 1.442695, %v1064_v13 }
 0x571   : > { %v1081_v9 = vmul.f32 1.442695, %v1065_v45 }
 0x573   : > { %3736 = vpow2.f32 %v1081_v9 }
 0x578   : > { %v1054_v44 = vpop.xlane.xlu1 %1053  ;;  %v1051_v11 = vpop.xlane.xlu0 %1050 }
 0x579   : > { %v1070_v18 = vsub.f32 %v4191_v16, %v1054_v44  ;;  %v1069_v21 = vsub.f32 %v4194_v17, %v1051_v11 }
 0x57a   : > { %v4249_v12 = vpop.eup %3734 }
 0x57b   : > { %v1112_v14 = vsel %vm1030_vm12, %v4249_v12, 0.0  ;;  %v1091_v16 = vmul.f32 1.442695, %v1070_v18  ;;  %v1089_v17 = vmul.f32 1.442695, %v1069_v21 }
 0x57c   : > { %v1060_v15 = vpop.xlane.xlu1 %1059  ;;  %v1045_v50 = vpop.xlane.xlu0 %1044  ;;  %1113 = vadd.xlane.f32.xlu1 %v1112_v14 }
 0x57d   : > { %v1072_v56 = vsub.f32 %v4197_v20, %v1060_v15  ;;  %v1067_v39 = vsub.f32 %v4204_v26, %v1045_v50 }
 0x57f   : > { %v1095_v22 = vmul.f32 1.442695, %v1072_v56  ;;  %v1085_v47 = vmul.f32 1.442695, %v1067_v39 }
 0x580   : > { %v4257_v24 = vpop.eup %3736  ;;  %v1231_v31 = vpop.permute.xlu1 %1230 }
 0x581   : > { %v1057_v34 = vpop.xlane.xlu0 %1056  ;;  %3738 = vpow2.f32 %v1095_v22  ;;  %3576 = vmatprep.subr.msk.bf16.mxu0 %vm1176_vm15, %v1231_v31  ;;  %v1240_v1 = vsel %vm1176_vm15, %v1231_v31, 0  ;;  %v1109_v20 = vsel %vm1023_vm14, %v4257_v24, 0.0 }
 0x582   : > { %v1071_v60 = vsub.f32 %v4211_v36, %v1057_v34  ;;  %3400 = vmatpush3.bf16.msra.mxu0 %v1240_v1  ;;  %1110 = vadd.xlane.f32.xlu0 %v1109_v20  ;;  %3740 = vpow2.f32 %v1079_v4 }
 0x584   : > { %v1093_v41 = vmul.f32 1.442695, %v1071_v60 }
 0x585   : > { %v1168_v43 = vpop.permute.xlu0 %1167 }
 0x586   : > { %3742 = vpow2.f32 %v1093_v41  ;;  %3575 = vmatprep.subr.msk.bf16.mxu1 %vm1176_vm15, %v1168_v43  ;;  %v1178_v36 = vsel %vm1176_vm15, %v1168_v43, 0 }
 0x587   : > { %3744 = vpow2.f32 %v1091_v16  ;;  %3392 = vmatpush3.bf16.msra.mxu1 %v1178_v36 }
 0x588   : > { %3746 = vpow2.f32 %v1089_v17 }
 0x589   : > { %3748 = vpow2.f32 %v1085_v47  ;;  %v1293_v37 = vpop.permute.xlu0 %1292 }
 0x58e   : > { %v4267_v48 = vpop.eup %3738 }
 0x58f   : > { %v1130_v49 = vsel %vm1030_vm12, %v4267_v48, 0.0  ;;  %v4271_v52 = vpop.eup %3740 }
 0x590   : > { %1131 = vadd.xlane.f32.xlu1 %v1130_v49  ;;  %v1106_v35 = vsel %vm1023_vm14, %v4271_v52, 0.0 }
 0x593   : > { %v4273_v26 = vpop.eup %3742 }
 0x594   : > { %v4275_v54 = vpop.eup %3744  ;;  %v1127_v28 = vsel %vm1023_vm14, %v4273_v26, 0.0  ;;  %1107 = vadd.xlane.f32.xlu1 %v1106_v35 }
 0x595   : > { %v4281_v38 = vpop.eup %3746  ;;  %1128 = vadd.xlane.f32.xlu0 %v1127_v28  ;;  %v1124_v62 = vsel %vm1023_vm14, %v4275_v54, 0.0 }
 0x596   : > { %v1121_v59 = vsel %vm1030_vm12, %v4281_v38, 0.0  ;;  %v4287_v0 = vpop.eup %3748 }
 0x597   : > { %v1115_v5 = vsel %vm1023_vm14, %v4287_v0, 0.0 }
 0x598   : > { %1125 = vadd.xlane.f32.xlu1 %v1124_v62 }
 0x599   : > { %1122 = vadd.xlane.f32.xlu0 %v1121_v59 }
 0x59d   : > { %1116 = vadd.xlane.f32.xlu0 %v1115_v5 }
 0x5b1   : > { %v1048_v6 = vpop.xlane.xlu1 %1047 }
 0x5b2   : > { %v1068_v27 = vsub.f32 %v4224_v32, %v1048_v6 }
 0x5b3   : > { %1290 = vrot.lane.b32.xlu0 %v4107_v46, %s3882_s8 }
 0x5b4   : > { %v1087_v7 = vmul.f32 1.442695, %v1068_v27 }
 0x5b5   : > { %v1166_v8 = vpop.permute.xlu1 %1165 }
 0x5b6   : > { %3750 = vpow2.f32 %v1087_v7  ;;  %3393 = vmatprep.subr.bf16.mxu1 %v1166_v8 }
 0x5b7   : > { %3394 = vmatpush3.bf16.msra.mxu1 %v1166_v8  ;;  %1465 = vrot.lane.b32.xlu0 %v4043_v29, %s3883_s10 }
 0x5b8   : > { %3577 = vmatprep.subr.msk.bf16.mxu1 %vm1176_vm15, %v1293_v37 }
 0x5b9   : > { %v1229_v45 = vpop.permute.xlu1 %1228  ;;  %v1105_v46 = vpop.xlane.xlu0 %1104 }
 0x5ba   : > { %3401 = vmatprep.subr.bf16.mxu0 %v1229_v45  ;;  %3752 = vrcp.f32 %v1105_v46 }
 0x5bb   : > { %3402 = vmatpush3.bf16.msra.mxu0 %v1229_v45 }
 0x5bd   : > { %v1355_v9 = vpop.permute.xlu1 %1354  ;;  %v1099_v11 = vpop.xlane.xlu0 %1098 }
 0x5be   : > { %3578 = vmatprep.subr.msk.bf16.mxu0 %vm1176_vm15, %v1355_v9  ;;  %3754 = vrcp.f32 %v1099_v11  ;;  %v1364_v6 = vsel %vm1176_vm15, %v1355_v9, 0 }
 0x5c3   : > { %v4296_v44 = vpop.eup %3750 }
 0x5c4   : > { %v1118_v32 = vsel %vm1023_vm14, %v4296_v44, 0.0 }
 0x5c5   : > { %1119 = vadd.xlane.f32.xlu1 %v1118_v32 }
 0x5c7   : > { %v3753_v14 = vpop.eup %3752 }
 0x5c8   : > { %v1147_v56 = vmul.f32 %v3753_v14, %v4228_v42 }
 0x5ca   : > { %v1158_v22 = vpack.c.bf16 %v1147_v56, %v1147_v56 }
 0x5cb   : > { %v3755_v15 = vpop.eup %3754 }
 0x5cc   : > { %v1145_v18 = vmul.f32 %v3755_v15, %v4232_v57 }
 0x5d6   : > { %1352 = vrot.lane.b32.xlu1 %v4113_v51, %s3882_s8  ;;  %v1302_v51 = vsel %vm1176_vm15, %v1293_v37, 0 }
 0x5ee   : > { %v1102_v13 = vpop.xlane.xlu1 %1101 }
 0x5ef   : > { %3756 = vrcp.f32 %v1102_v13 }
 0x5fc   : > { %v3757_v50 = vpop.eup %3756 }
 0x5fd   : > { %v1146_v4 = vmul.f32 %v3757_v50, %v4243_v3 }
 0x5ff   : > { %v1157_v21 = vpack.c.bf16 %v1146_v4, %v1145_v18 }
 0x601   : > { %3395 = vmatprep.mubr.msk.bf16.mxu1 %vm1023_vm14, %v1157_v21 }
 0x602   : > { %3396 = vmatmul.mubr.msk.bf16.vlgmr.msra.gmra.mxu1 %vm1023_vm14, %v1158_v22 }
 0x603   : > { %3408 = vmatpush3.bf16.msra.mxu1 %v1302_v51 }
 0x605   : > { %v1114_v31 = vpop.xlane.xlu1 %1113 }
 0x606   : > { %3758 = vrcp.f32 %v1114_v31 }
 0x60b   : > { %v1111_v34 = vpop.xlane.xlu0 %1110 }
 0x60c   : > { %3760 = vrcp.f32 %v1111_v34 }
 0x613   : > { %v3759_v16 = vpop.eup %3758 }
 0x614   : > { %v1150_v43 = vmul.f32 %v3759_v16, %v4249_v12 }
 0x616   : > { %v1160_v59 = vpack.c.bf16 %v1150_v43, %v1150_v43 }
 0x619   : > { %v1132_v60 = vpop.xlane.xlu1 %1131  ;;  %v3761_v39 = vpop.eup %3760 }
 0x61a   : > { %v1149_v47 = vmul.f32 %v3761_v39, %v4257_v24 }
 0x61d   : > { %v1108_v42 = vpop.xlane.xlu1 %1107 }
 0x61e   : > { %v1129_v1 = vpop.xlane.xlu0 %1128  ;;  %3762 = vrcp.f32 %v1108_v42 }
 0x61f   : > { %3764 = vrcp.f32 %v1129_v1 }
 0x621   : > { %v1126_v3 = vpop.xlane.xlu1 %1125 }
 0x622   : > { %v1123_v57 = vpop.xlane.xlu0 %1122  ;;  %3766 = vrcp.f32 %v1126_v3 }
 0x623   : > { %3768 = vrcp.f32 %v1132_v60 }
 0x624   : > { %3770 = vrcp.f32 %v1123_v57 }
 0x626   : > { %v1117_v20 = vpop.xlane.xlu0 %1116 }
 0x627   : > { %3772 = vrcp.f32 %v1117_v20 }
 0x62a   : > { %v1291_v17 = vpop.permute.xlu0 %1290 }
 0x62b   : > { %3409 = vmatprep.subr.bf16.mxu1 %v1291_v17  ;;  %v3763_v41 = vpop.eup %3762 }
 0x62c   : > { %3410 = vmatpush3.bf16.msra.mxu1 %v1291_v17  ;;  %v1148_v36 = vmul.f32 %v3763_v41, %v4271_v52  ;;  %v3765_v49 = vpop.eup %3764 }
 0x62d   : > { %v1155_v5 = vmul.f32 %v3765_v49, %v4273_v26 }
 0x62e   : > { %v1159_v28 = vpack.c.bf16 %v1149_v47, %v1148_v36 }
 0x62f   : > { %v3767_v35 = vpop.eup %3766 }
 0x630   : > { %3403 = vmatprep.mubr.msk.bf16.mxu0 %vm1023_vm14, %v1159_v28  ;;  %v1154_v62 = vmul.f32 %v3767_v35, %v4275_v54  ;;  %v3769_v24 = vpop.eup %3768 }
 0x631   : > { %3404 = vmatmul.mubr.msk.bf16.vlgmr.msra.gmra.mxu0 %vm1023_vm14, %v1160_v59  ;;  %v1156_v26 = vmul.f32 %v3769_v24, %v4267_v48  ;;  %v3771_v7 = vpop.eup %3770  ;;  %v1466_v48 = vpop.permute.xlu0 %1465 }
 0x632   : > { %3416 = vmatpush3.bf16.msra.mxu0 %v1364_v6  ;;  %v1163_v12 = vpack.c.bf16 %v1155_v5, %v1154_v62  ;;  %v1153_v45 = vmul.f32 %v3771_v7, %v4281_v38  ;;  %3423 = vmatprep.subr.bf16.mxu1 %v1466_v48  ;;  %v1528_v7 = vsub.s32 2, %v4009_v58 }
 0x633   : > { %v1164_v27 = vpack.c.bf16 %v1156_v26, %v1156_v26 }
 0x634   : > { %3419 = vmatprep.mubr.msk.bf16.mxu0 %vm1023_vm14, %v1163_v12  ;;  %v3773_v8 = vpop.eup %3772  ;;  %v1162_v46 = vpack.c.bf16 %v1153_v45, %v1153_v45 }
 0x635   : > { %v1151_v29 = vmul.f32 %v3773_v8, %v4287_v0  ;;  %v1529_v8 = vrot.slane %v4058_v55, %v1528_v7 }
 0x64e   : > { %v1120_v52 = vpop.xlane.xlu1 %1119 }
 0x64f   : > { %3774 = vrcp.f32 %v1120_v52 }
 0x652   : > { %v1353_v54 = vpop.permute.xlu1 %1352 }
 0x653   : > { %3417 = vmatprep.subr.bf16.mxu0 %v1353_v54 }
 0x654   : > { %3418 = vmatpush3.bf16.msra.mxu0 %v1353_v54 }
 0x657   : > { %3420 = vmatmul.mubr.msk.bf16.vlgmr.msra.gmra.mxu0 %vm1023_vm14, %v1164_v27 }
 0x65c   : > { %v3775_v37 = vpop.eup %3774 }
 0x65d   : > { %v1152_v9 = vmul.f32 %v3775_v37, %v4296_v44 }
 0x65f   : > { %v1161_v32 = vpack.c.bf16 %v1152_v9, %v1151_v29 }
 0x661   : > { %3411 = vmatprep.mubr.msk.bf16.mxu1 %vm1023_vm14, %v1161_v32 }
 0x662   : > { %3412 = vmatmul.mubr.msk.bf16.vlgmr.msra.gmra.mxu1 %vm1023_vm14, %v1162_v46 }
 0x663   : > { %3424 = vmatpush3.bf16.msra.mxu1 %v1466_v48 }
 0x6c2   : > { %v3397_v11 = vpop.f32.mrf.mxu1 }
 0x6c4   : > { %v1214_v13 = vpop.f32.mrf.mxu1 }
 0x6c6   : > { %v3398_v14 = vpop.f32.mrf.mxu1 }
 0x6c8   : > { %v1217_v51 = vpop.f32.mrf.mxu1 }
 0x6f1   : > { %v3405_v15 = vpop.f32.mrf.mxu0 }
 0x6f2   : > { %1421 = vrot.lane.b32.xlu0 %v3405_v15, %s3884_s11 }
 0x6f3   : > { %v1276_v38 = vpop.f32.mrf.mxu0 }
 0x6f5   : > { %v3406_v0 = vpop.f32.mrf.mxu0 }
 0x6f7   : > { %v1279_v50 = vpop.f32.mrf.mxu0 }
 0x6f8   : > { %v3626_v44 = vpack.i.bf16 %v1279_v50, %v1276_v38 }
 0x6fa   : > { %3627 = vrot.lane.b32.xlu1 %v3626_v44, %s3884_s11 }
 0x717   : > { %v3421_v56 = vpop.f32.mrf.mxu0 }
 0x719   : > { %v1400_v18 = vpop.f32.mrf.mxu0 }
 0x71b   : > { %v3422_v4 = vpop.f32.mrf.mxu0 }
 0x71d   : > { %v1403_v21 = vpop.f32.mrf.mxu0 }
 0x71e   : > { %v3631_v22 = vpack.i.bf16 %v1403_v21, %v1400_v18  ;;  %v3693_v18 = vld [vmem:[%s4831_s3 + $0x4] ss:$8 sps:$4 sm:$0xff]  }
 0x720   : > { %3632 = vrot.lane.b32.xlu1 %v3631_v22, %s3885_s12 }
 0x722   : > { %v3413_v31 = vpop.f32.mrf.mxu1 }
 0x723   : > { %1433 = vrot.lane.b32.xlu0 %v3413_v31, %s3886_s13 }
 0x724   : > { %v1338_v34 = vpop.f32.mrf.mxu1 }
 0x726   : > { %v3414_v60 = vpop.f32.mrf.mxu1 }
 0x727   : > { %1463 = vrot.lane.b32.xlu0 %v4048_v30, %s3883_s10 }
 0x728   : > { %v1341_v1 = vpop.f32.mrf.mxu1 }
 0x729   : > { %v3636_v42 = vpack.i.bf16 %v1341_v1, %v1338_v34 }
 0x72b   : > { %3637 = vrot.lane.b32.xlu1 %v3636_v42, %s3886_s13 }
 0x72f   : > { %1445 = vrot.lane.b32.xlu1 %v3421_v56, %s3885_s12  ;;  %v3692_v56 = vld [vmem:[%s4831_s3 + $0x14] ss:$8 sps:$4 sm:$0xff]  }
 0x730   : > { %3431 = vmatprep.subr.bf16.mxu0 %v3692_v56 }
 0x731   : > { %3432 = vmatpush3.bf16.msra.mxu0 %v3692_v56  ;;  %v3163_v56 = vld [vmem:[%s4834_s6 + $0x1] ss:$0 sm:$0xff] }
 0x732   : > { %3433 = vmatprep.subr.bf16.mxu0 %v3693_v18 }
 0x735   : > { %3434 = vmatpush3.bf16.msra.mxu0 %v3693_v18 }
 0x764   : > { %v1422_v57 = vpop.permute.xlu0 %1421 }
 0x765   : > { %v1452_v59 = vsel %vm740_vm3, %v3397_v11, %v1422_v57 }
 0x76c   : > { %v3628_v3 = vpop.permute.xlu1 %3627 }
 0x76d   : > { %v3630_v39 = vunpack.i.h.bf16 %v3628_v3  ;;  %v3629_v41 = vunpack.i.l.bf16 %v3628_v3 }
 0x76f   : > { %v1451_v30 = vsel %vm740_vm3, %v1217_v51, %v3630_v39  ;;  %v1450_v49 = vsel %vm740_vm3, %v1214_v13, %v3629_v41 }
 0x792   : > { %v3633_v16 = vpop.permute.xlu1 %3632 }
 0x793   : > { %v3635_v28 = vunpack.i.h.bf16 %v3633_v16  ;;  %v3634_v35 = vunpack.i.l.bf16 %v3633_v16 }
 0x795   : > { %v1434_v20 = vpop.permute.xlu0 %1433 }
 0x796   : > { %v1456_v6 = vsel %vm1453_vm0, %v1452_v59, %v1434_v20 }
 0x799   : > { %v1464_v17 = vpop.permute.xlu0 %1463 }
 0x79a   : > { %3425 = vmatprep.subr.bf16.mxu1 %v1464_v17 }
 0x79b   : > { %3426 = vmatpush3.bf16.msra.mxu1 %v1464_v17 }
 0x79d   : > { %v3638_v43 = vpop.permute.xlu1 %3637 }
 0x79e   : > { %v3640_v36 = vunpack.i.h.bf16 %v3638_v43  ;;  %v3639_v47 = vunpack.i.l.bf16 %v3638_v43 }
 0x7a0   : > { %v1454_v62 = vsel %vm1453_vm0, %v1450_v49, %v3639_v47  ;;  %v1455_v5 = vsel %vm1453_vm0, %v1451_v30, %v3640_v36 }
 0x7a1   : > { %v1446_v12 = vpop.permute.xlu1 %1445  ;;  %v1458_v24 = vsel %vm1457_vm4, %v1454_v62, %v3634_v35  ;;  %v1459_v52 = vsel %vm1457_vm4, %v1455_v5, %v3635_v28  ;;  %v1580_v28 = vsub.s32 3, %v4009_v58  ;;  %v3708_v58 = vld [vmem:[%s4832_s4 + $0x78] sm:$0xff]  }
 0x7a2   : > { %v1460_v26 = vsel %vm1457_vm4, %v1456_v6, %v1446_v12  ;;  %v1461_v54 = vpack.c.bf16 %v1459_v52, %v1458_v24  ;;  %v4385_v6 = vld [vmem:[%s4833_s5] sm:$0xff] }
 0x7a3   : > { %v1462_v27 = vpack.c.bf16 %v1460_v26, %v1460_v26  ;;  %v1581_v12 = vrot.slane %v4385_v6, %v1580_v28 }
 0x7a4   : > { %3427 = vmatprep.mubr.msk.bf16.mxu1 %vm452_vm1, %v1461_v54 }
 0x7a5   : > { %3428 = vmatmul.mubr.msk.bf16.vlgmr.msra.gmra.mxu1 %vm452_vm1, %v1462_v27 }
 0x865   : > { %v3429_v37 = vpop.f32.mrf.mxu1 }
 0x866   : > { %v1525_v45 = vadd.f32 %v3429_v37, %v4030_v23  ;;  %v1588_v37 = vrot.slane %v4385_v6, %v4012_v63 }
 0x867   : > { %v1509_v29 = vpop.f32.mrf.mxu1 }
 0x868   : > { %v4350_v9 = vadd.f32 %v1529_v8, %v1525_v45  ;;  %v1523_v32 = vadd.f32 %v1509_v29, %v4019_v10 }
 0x869   : > { %v3430_v46 = vpop.f32.mrf.mxu1 }
 0x86a   : > { %v4353_v48 = vadd.f32 %v1529_v8, %v1523_v32  ;;  %v1539_v11 = vsel %vm459_vm2, %v4350_v9, 0.0  ;;  %v1547_v38 = vmul.f32 %v4350_v9, %v4350_v9 }
 0x86b   : > { %1540 = vadd.xlane.f32.xlu0 %v1539_v11  ;;  %v1512_v13 = vpop.f32.mrf.mxu1 }
 0x86c   : > { %v1524_v14 = vadd.f32 %v1512_v13, %v4026_v19  ;;  %v1533_v23 = vsel %vm452_vm1, %v4353_v48, 0.0  ;;  %v1545_v55 = vmul.f32 %v4353_v48, %v4353_v48  ;;  %v1554_v50 = vsel %vm459_vm2, %v1547_v38, 0.0  ;;  %v3697_v38 = vld [vmem:[%s4832_s4 + $0x20] sm:$0xff]  }
 0x86e   : > { %v4358_v15 = vadd.f32 %v1529_v8, %v1524_v14  ;;  %v1548_v0 = vsel %vm452_vm1, %v1545_v55, 0.0  ;;  %v3695_v55 = vld [vmem:[%s4832_s4 + $0x30] sm:$0xff]  }
 0x86f   : > { %1534 = vadd.xlane.f32.xlu0 %v1533_v23  ;;  %v3694_v23 = vld [vmem:[%s4832_s4 + $0x38] sm:$0xff]  }
 0x870   : > { %v1536_v10 = vsel %vm452_vm1, %v4358_v15, 0.0  ;;  %v1546_v19 = vmul.f32 %v4358_v15, %v4358_v15  ;;  %3439 = vmatprep.subr.bf16.mxu1 %v3694_v23 }
 0x871   : > { %1537 = vadd.xlane.f32.xlu1 %v1536_v10  ;;  %3440 = vmatpush3.bf16.msra.mxu1 %v3694_v23  ;;  %v3696_v10 = vld [vmem:[%s4832_s4 + $0x28] sm:$0xff]  }
 0x872   : > { %v1551_v44 = vsel %vm452_vm1, %v1546_v19, 0.0  ;;  %3441 = vmatprep.subr.bf16.mxu1 %v3695_v55  ;;  %v3699_v19 = vld [vmem:[%s4832_s4 + $0x10] sm:$0xff]  }
 0x873   : > { %1549 = vadd.xlane.f32.xlu0 %v1548_v0  ;;  %v3698_v0 = vld [vmem:[%s4832_s4 + $0x18] sm:$0xff]  }
 0x875   : > { %1555 = vadd.xlane.f32.xlu1 %v1554_v50  ;;  %3442 = vmatpush3.bf16.msra.mxu1 %v3695_v55  ;;  %v3700_v50 = vld [vmem:[%s4832_s4 + $0x8] sm:$0xff]  }
 0x876   : > { %3443 = vmatprep.subr.bf16.mxu1 %v3696_v10 }
 0x877   : > { %1552 = vadd.xlane.f32.xlu0 %v1551_v44  ;;  %v3701_v44 = vld [vmem:[%s4832_s4] sm:$0xff]  }
 0x879   : > { %3444 = vmatpush3.bf16.msra.mxu1 %v3696_v10  ;;  %v4451_v10 = vld [vmem:[%s4831_s3 + $0x30] ss:$8 sps:$4 sm:$0xff]  }
 0x87a   : > { %3445 = vmatprep.subr.bf16.mxu1 %v3697_v38  ;;  %3459 = vmatprep.subr.bf16.mxu0 %v4451_v10 }
 0x87d   : > { %3446 = vmatpush3.bf16.msra.mxu1 %v3697_v38  ;;  %v4457_v38 = vld [vmem:[%s4831_s3 + $0x20] ss:$8 sps:$4 sm:$0xff]  }
 0x87e   : > { %3447 = vmatprep.subr.bf16.mxu1 %v3698_v0 }
 0x881   : > { %3448 = vmatpush3.bf16.msra.mxu1 %v3698_v0 }
 0x882   : > { %3449 = vmatprep.subr.bf16.mxu1 %v3699_v19 }
 0x885   : > { %3450 = vmatpush3.bf16.msra.mxu1 %v3699_v19 }
 0x886   : > { %3451 = vmatprep.subr.bf16.mxu1 %v3700_v50 }
 0x889   : > { %3452 = vmatpush3.bf16.msra.mxu1 %v3700_v50 }
 0x88a   : > { %3453 = vmatprep.subr.bf16.mxu1 %v3701_v44 }
 0x88d   : > { %3454 = vmatpush3.bf16.msra.mxu1 %v3701_v44 }
 0x8f4   : > { %v1541_v4 = vpop.xlane.xlu0 %1540 }
 0x8f5   : > { %v1544_v31 = vmul.f32 0.03125, %v1541_v4 }
 0x8f7   : > { %v1562_v3 = vmul.f32 %v1544_v31, %v1544_v31  ;;  %v1568_v62 = vsub.f32 %v4350_v9, %v1544_v31 }
 0x8f8   : > { %v1535_v21 = vpop.xlane.xlu0 %1534 }
 0x8f9   : > { %v1542_v22 = vmul.f32 0.03125, %v1535_v21 }
 0x8fa   : > { %v1538_v51 = vpop.xlane.xlu1 %1537 }
 0x8fb   : > { %v1560_v60 = vmul.f32 %v1542_v22, %v1542_v22  ;;  %v1543_v1 = vmul.f32 0.03125, %v1538_v51  ;;  %v1566_v35 = vsub.f32 %v4353_v48, %v1542_v22 }
 0x8fc   : > { %v1550_v34 = vpop.xlane.xlu0 %1549 }
 0x8fd   : > { %v1557_v42 = vmul.f32 0.03125, %v1550_v34  ;;  %v1561_v39 = vmul.f32 %v1543_v1, %v1543_v1  ;;  %v1567_v52 = vsub.f32 %v4358_v15, %v1543_v1 }
 0x8fe   : > { %v1556_v57 = vpop.xlane.xlu1 %1555 }
 0x8ff   : > { %v1563_v20 = vsub.f32 %v1557_v42, %v1560_v60  ;;  %v1559_v16 = vmul.f32 0.03125, %v1556_v57 }
 0x900   : > { %v1553_v17 = vpop.xlane.xlu0 %1552 }
 0x901   : > { %v1569_v41 = vadd.f32 1e-05, %v1563_v20  ;;  %v1565_v43 = vsub.f32 %v1559_v16, %v1562_v3  ;;  %v1558_v36 = vmul.f32 0.03125, %v1553_v17 }
 0x903   : > { %3776 = vrsqrt.f32 %v1569_v41  ;;  %v1571_v47 = vadd.f32 1e-05, %v1565_v43  ;;  %v1564_v30 = vsub.f32 %v1558_v36, %v1561_v39 }
 0x905   : > { %3778 = vrsqrt.f32 %v1571_v47  ;;  %v1570_v49 = vadd.f32 1e-05, %v1564_v30 }
 0x907   : > { %3780 = vrsqrt.f32 %v1570_v49 }
 0x910   : > { %v3777_v59 = vpop.eup %3776 }
 0x911   : > { %v1575_v5 = vmul.f32 %v3777_v59, %v1566_v35 }
 0x912   : > { %v3779_v24 = vpop.eup %3778 }
 0x913   : > { %v1577_v26 = vmul.f32 %v3779_v24, %v1568_v62  ;;  %v1582_v8 = vmul.f32 %v1581_v12, %v1575_v5  ;;  %v1804_v24 = vrot.slane %v4385_v6, %v4015_v2 }
 0x914   : > { %v3781_v54 = vpop.eup %3780 }
 0x915   : > { %v1576_v27 = vmul.f32 %v3781_v54, %v1567_v52  ;;  %v1584_v45 = vmul.f32 %v1581_v12, %v1577_v26  ;;  %v1589_v46 = vadd.f32 %v1588_v37, %v1582_v8 }
 0x917   : > { %v1583_v29 = vmul.f32 %v1581_v12, %v1576_v27  ;;  %v1591_v32 = vadd.f32 %v1588_v37, %v1584_v45 }
 0x919   : > { %v1590_v11 = vadd.f32 %v1588_v37, %v1583_v29  ;;  %v1593_v14 = vpack.c.bf16 %v1591_v32, %v1591_v32 }
 0x91b   : > { %v1592_v13 = vpack.c.bf16 %v1590_v11, %v1589_v46 }
 0x91d   : > { %3435 = vmatprep.mubr.msk.bf16.mxu0 %vm452_vm1, %v1592_v13 }
 0x91e   : > { %3436 = vmatmul.mubr.msk.bf16.vlgmr.msra.gmra.mxu0 %vm452_vm1, %v1593_v14 }
 0x91f   : > { %3460 = vmatpush3.bf16.msra.mxu0 %v4451_v10 }
 0x920   : > { %3461 = vmatprep.subr.bf16.mxu0 %v4457_v38 }
 0x923   : > { %3462 = vmatpush3.bf16.msra.mxu0 %v4457_v38 }
 0x9de   : > { %v3437_v18 = vpop.f32.mrf.mxu0 }
 0x9df   : > { %v1655_v4 = vadd.f32 %v3437_v18, %v3163_v56 }
 0x9e0   : > { %v1646_v21 = vpop.f32.mrf.mxu0 }
 0x9e1   : > { %v3170_v22 = vmul.f32 -1.702, %v1655_v4  ;;  %v1647_v51 = vadd.f32 %v3163_v56, %v1646_v21 }
 0x9e2   : > { %v3438_v31 = vpop.f32.mrf.mxu0 }
 0x9e3   : > { %v1670_v34 = vmul.f32 1.442695, %v3170_v22  ;;  %v3168_v60 = vmul.f32 -1.702, %v1647_v51 }
 0x9e4   : > { %v1649_v1 = vpop.f32.mrf.mxu0 }
 0x9e5   : > { %3782 = vpow2.f32 %v1670_v34  ;;  %v1666_v42 = vmul.f32 1.442695, %v3168_v60  ;;  %v1650_v57 = vadd.f32 %v3163_v56, %v1649_v1 }
 0x9e7   : > { %3784 = vpow2.f32 %v1666_v42  ;;  %v3169_v3 = vmul.f32 -1.702, %v1650_v57 }
 0x9e9   : > { %v1668_v20 = vmul.f32 1.442695, %v3169_v3 }
 0x9eb   : > { %3786 = vpow2.f32 %v1668_v20 }
 0x9f2   : > { %v3783_v16 = vpop.eup %3782 }
 0x9f3   : > { %v1674_v39 = vadd.f32 1.0, %v3783_v16 }
 0x9f4   : > { %v3785_v17 = vpop.eup %3784 }
 0x9f5   : > { %v1672_v41 = vadd.f32 1.0, %v3785_v17  ;;  %3788 = vrcp.f32 %v1674_v39 }
 0x9f7   : > { %3790 = vrcp.f32 %v1672_v41  ;;  %v4465_v41 = vld [vmem:[%s4833_s5 + $0x8] sm:$0xff] }
 0x9f8   : > { %v3787_v43 = vpop.eup %3786 }
 0x9f9   : > { %v1673_v36 = vadd.f32 1.0, %v3787_v43 }
 0x9fb   : > { %3792 = vrcp.f32 %v1673_v36 }
 0xa02   : > { %v3789_v47 = vpop.eup %3788 }
 0xa03   : > { %v1683_v35 = vmul.f32 %v3789_v47, %v1655_v4  ;;  %v1866_v47 = vrot.slane %v4465_v41, %v612_v53 }
 0xa04   : > { %v3791_v30 = vpop.eup %3790 }
 0xa05   : > { %v1681_v59 = vmul.f32 %v3791_v30, %v1647_v51  ;;  %v1685_v12 = vpack.c.bf16 %v1683_v35, %v1683_v35 }
 0xa08   : > { %v3793_v49 = vpop.eup %3792 }
 0xa09   : > { %v1682_v62 = vmul.f32 %v3793_v49, %v1650_v57 }
 0xa0b   : > { %v1684_v5 = vpack.c.bf16 %v1682_v62, %v1681_v59  ;;  %v1873_v59 = vrot.slane %v4465_v41, %v619_v61  ;;  %v3186_v61 = vld [vmem:[%s4834_s6 + $0x2] ss:$0 sm:$0xff] }
 0xa0d   : > { %3455 = vmatprep.mubr.bf16.mxu1 %v1684_v5 }
 0xa0e   : > { %3456 = vmatmul.mubr.bf16.vlgmr.msra.gmra.mxu1 %v1685_v12 }
 0xace   : > { %v3457_v52 = vpop.f32.mrf.mxu1 }
 0xacf   : > { %v1800_v26 = vadd.f32 %v3457_v52, %v4350_v9 }
 0xad0   : > { %v1784_v54 = vpop.f32.mrf.mxu1 }
 0xad1   : > { %v4425_v27 = vadd.f32 %v1804_v24, %v1800_v26  ;;  %v1798_v8 = vadd.f32 %v1784_v54, %v4353_v48 }
 0xad2   : > { %v3458_v37 = vpop.f32.mrf.mxu1 }
 0xad3   : > { %v4428_v45 = vadd.f32 %v1804_v24, %v1798_v8  ;;  %v1824_v29 = vsel %vm459_vm2, %v4425_v27, 0.0  ;;  %v1832_v23 = vmul.f32 %v4425_v27, %v4425_v27 }
 0xad4   : > { %1825 = vadd.xlane.f32.xlu0 %v1824_v29  ;;  %v1787_v32 = vpop.f32.mrf.mxu1 }
 0xad5   : > { %v1799_v46 = vadd.f32 %v1787_v32, %v4358_v15  ;;  %v1830_v6 = vmul.f32 %v4428_v45, %v4428_v45  ;;  %v1818_v48 = vsel %vm452_vm1, %v4428_v45, 0.0  ;;  %v1839_v55 = vsel %vm459_vm2, %v1832_v23, 0.0 }
 0xad7   : > { %v4435_v11 = vadd.f32 %v1804_v24, %v1799_v46  ;;  %v1833_v9 = vsel %vm452_vm1, %v1830_v6, 0.0 }
 0xad8   : > { %1834 = vadd.xlane.f32.xlu1 %v1833_v9  ;;  %1819 = vadd.xlane.f32.xlu0 %v1818_v48 }
 0xad9   : > { %v1831_v13 = vmul.f32 %v4435_v11, %v4435_v11  ;;  %v1821_v15 = vsel %vm452_vm1, %v4435_v11, 0.0 }
 0xadb   : > { %v1836_v14 = vsel %vm452_vm1, %v1831_v13, 0.0 }
 0xadc   : > { %1837 = vadd.xlane.f32.xlu0 %v1836_v14  ;;  %1822 = vadd.xlane.f32.xlu1 %v1821_v15 }
 0xae0   : > { %1840 = vadd.xlane.f32.xlu1 %v1839_v55 }
 0xb5d   : > { %v1826_v0 = vpop.xlane.xlu0 %1825 }
 0xb5e   : > { %v1829_v22 = vmul.f32 0.03125, %v1826_v0 }
 0xb60   : > { %v1847_v57 = vmul.f32 %v1829_v22, %v1829_v22  ;;  %v1853_v62 = vsub.f32 %v4425_v27, %v1829_v22 }
 0xb61   : > { %v1835_v19 = vpop.xlane.xlu1 %1834  ;;  %v1820_v50 = vpop.xlane.xlu0 %1819 }
 0xb62   : > { %v1827_v44 = vmul.f32 0.03125, %v1820_v50  ;;  %v1842_v56 = vmul.f32 0.03125, %v1835_v19 }
 0xb64   : > { %v1845_v18 = vmul.f32 %v1827_v44, %v1827_v44  ;;  %v1851_v43 = vsub.f32 %v4428_v45, %v1827_v44 }
 0xb65   : > { %v1838_v4 = vpop.xlane.xlu0 %1837  ;;  %v1823_v21 = vpop.xlane.xlu1 %1822 }
 0xb66   : > { %v1848_v51 = vsub.f32 %v1842_v56, %v1845_v18  ;;  %v1828_v31 = vmul.f32 0.03125, %v1823_v21  ;;  %v1843_v60 = vmul.f32 0.03125, %v1838_v4 }
 0xb68   : > { %v1854_v34 = vadd.f32 1e-05, %v1848_v51  ;;  %v1846_v1 = vmul.f32 %v1828_v31, %v1828_v31  ;;  %v1852_v49 = vsub.f32 %v4435_v11, %v1828_v31 }
 0xb69   : > { %v1841_v42 = vpop.xlane.xlu1 %1840 }
 0xb6a   : > { %3794 = vrsqrt.f32 %v1854_v34  ;;  %v1849_v3 = vsub.f32 %v1843_v60, %v1846_v1  ;;  %v1844_v20 = vmul.f32 0.03125, %v1841_v42 }
 0xb6c   : > { %v1855_v16 = vadd.f32 1e-05, %v1849_v3  ;;  %v1850_v17 = vsub.f32 %v1844_v20, %v1847_v57 }
 0xb6e   : > { %3796 = vrsqrt.f32 %v1855_v16  ;;  %v1856_v39 = vadd.f32 1e-05, %v1850_v17 }
 0xb70   : > { %3798 = vrsqrt.f32 %v1856_v39 }
 0xb77   : > { %v3795_v36 = vpop.eup %3794 }
 0xb78   : > { %v1860_v30 = vmul.f32 %v3795_v36, %v1851_v43 }
 0xb7a   : > { %v1867_v5 = vmul.f32 %v1866_v47, %v1860_v30 }
 0xb7b   : > { %v3797_v35 = vpop.eup %3796 }
 0xb7c   : > { %v1861_v12 = vmul.f32 %v3797_v35, %v1852_v49  ;;  %v1874_v54 = vadd.f32 %v1873_v59, %v1867_v5 }
 0xb7d   : > { %v3799_v24 = vpop.eup %3798 }
 0xb7e   : > { %v1868_v52 = vmul.f32 %v1866_v47, %v1861_v12  ;;  %v1862_v26 = vmul.f32 %v3799_v24, %v1853_v62 }
 0xb80   : > { %v1875_v8 = vadd.f32 %v1873_v59, %v1868_v52  ;;  %v1869_v37 = vmul.f32 %v1866_v47, %v1862_v26 }
 0xb82   : > { %v1877_v29 = vpack.c.bf16 %v1875_v8, %v1874_v54  ;;  %v1876_v53 = vadd.f32 %v1873_v59, %v1869_v37 }
 0xb84   : > { %3463 = vmatprep.mubr.msk.bf16.mxu0 %vm452_vm1, %v1877_v29  ;;  %v1878_v32 = vpack.c.bf16 %v1876_v53, %v1876_v53 }
 0xb86   : > { %3464 = vmatmul.mubr.msk.bf16.vlgmr.msra.gmra.mxu0 %vm452_vm1, %v1878_v32 }
 0xc46   : > { %v3465_v46 = vpop.f32.mrf.mxu0 }
 0xc47   : > { %v1944_v6 = vadd.f32 %v3465_v46, %v3186_v61 }
 0xc48   : > { %v1935_v9 = vpop.f32.mrf.mxu0 }
 0xc49   : > { %1956 = vrot.lane.b32.xlu0 %v1944_v6, %s3877_s27  ;;  %v1936_v14 = vadd.f32 %v3186_v61, %v1935_v9  ;;  %v4488_v0 = vpack.c.bf16 %v1944_v6, %v1944_v6 }
 0xc4a   : > { %v3466_v48 = vpop.f32.mrf.mxu0 }
 0xc4c   : > { %v1938_v13 = vpop.f32.mrf.mxu0 }
 0xc4d   : > { %v1939_v15 = vadd.f32 %v3186_v61, %v1938_v13 }
 0xc4f   : > { %v3646_v23 = vpack.i.bf16 %v1939_v15, %v1936_v14  ;;  %v4482_v55 = vpack.c.bf16 %v1939_v15, %v1936_v14 }
 0xc51   : > { %3647 = vrot.lane.b32.xlu0 %v3646_v23, %s3878_s28  ;;  %3642 = vrot.lane.b32.xlu1 %v3646_v23, %s3877_s27 }
 0xc52   : > { %3471 = vmatprep.mubr.msk.bf16.mxu1 %vm740_vm3, %v4482_v55 }
 0xc55   : > { %1991 = vrot.lane.b32.xlu0 %v4488_v0, %s3879_s29  ;;  %1965 = vrot.lane.b32.xlu1 %v1944_v6, %s3878_s28 }
 0xc59   : > { %1974 = vrot.lane.b32.xlu1 %v1944_v6, %s3880_s30  ;;  %1989 = vrot.lane.b32.xlu0 %v4482_v55, %s3879_s29 }
 0xc5d   : > { %3652 = vrot.lane.b32.xlu1 %v3646_v23, %s3880_s30 }
 0xcbb   : > { %v1957_v19 = vpop.permute.xlu0 %1956 }
 0xcbc   : > { %v4497_v50 = vpack.c.bf16 %v1957_v19, %v1957_v19 }
 0xcbe   : > { %2057 = vrot.lane.b32.xlu1 %v4497_v50, %s3879_s29 }
 0xcc3   : > { %v3648_v44 = vpop.permute.xlu0 %3647  ;;  %v3643_v56 = vpop.permute.xlu1 %3642 }
 0xcc4   : > { %v3645_v18 = vunpack.i.h.bf16 %v3643_v56  ;;  %v3644_v4 = vunpack.i.l.bf16 %v3643_v56  ;;  %v3650_v31 = vunpack.i.h.bf16 %v3648_v44  ;;  %v3649_v34 = vunpack.i.l.bf16 %v3648_v44 }
 0xcc6   : > { %v4501_v21 = vpack.c.bf16 %v3645_v18, %v3644_v4  ;;  %v4513_v3 = vpack.c.bf16 %v3650_v31, %v3649_v34 }
 0xcc7   : > { %v1992_v22 = vpop.permute.xlu0 %1991  ;;  %v1966_v51 = vpop.permute.xlu1 %1965 }
 0xcc8   : > { %v2003_v60 = vsel %vm740_vm3, %v1992_v22, 0  ;;  %v4504_v1 = vpack.c.bf16 %v1966_v51, %v1966_v51  ;;  %3579 = vmatprep.subr.msk.bf16.mxu1 %vm740_vm3, %v1992_v22  ;;  %2055 = vrot.lane.b32.xlu1 %v4501_v21, %s3879_s29 }
 0xcc9   : > { %3479 = vmatprep.mubr.msk.bf16.mxu0 %vm740_vm3, %v4501_v21  ;;  %3468 = vmatpush3.bf16.xpose.msra.mxu1 %v2003_v60 }
 0xcca   : > { %2123 = vrot.lane.b32.xlu0 %v4504_v1, %s3879_s29 }
 0xccb   : > { %v1975_v42 = vpop.permute.xlu1 %1974  ;;  %v1990_v57 = vpop.permute.xlu0 %1989 }
 0xccc   : > { %v4515_v20 = vpack.c.bf16 %v1975_v42, %v1975_v42  ;;  %3580 = vmatprep.subr.msk.bf16.mxu1 %vm740_vm3, %v1990_v57  ;;  %v2000_v17 = vsel %vm740_vm3, %v1990_v57, 0 }
 0xcce   : > { %2189 = vrot.lane.b32.xlu1 %v4515_v20, %s3879_s29  ;;  %2121 = vrot.lane.b32.xlu0 %v4513_v3, %s3879_s29 }
 0xccf   : > { %v3653_v16 = vpop.permute.xlu1 %3652 }
 0xcd0   : > { %v3655_v39 = vunpack.i.h.bf16 %v3653_v16  ;;  %v3654_v43 = vunpack.i.l.bf16 %v3653_v16 }
 0xcd1   : > { %3470 = vmatpush3.bf16.xpose.msra.mxu1 %v2000_v17 }
 0xcd2   : > { %v4523_v36 = vpack.c.bf16 %v3655_v39, %v3654_v43 }
 0xcd4   : > { %2187 = vrot.lane.b32.xlu1 %v4523_v36, %s3879_s29 }
 0xcd8   : > { %3472 = vmatmul.mubr.msk.bf16.vlgmr.msra.gmra.mxu1 %vm740_vm3, %v4488_v0 }
 0xcd9   : > { %3487 = vmatprep.mubr.msk.bf16.mxu1 %vm740_vm3, %v4513_v3 }
 0xd30   : > { %v2058_v47 = vpop.permute.xlu1 %2057 }
 0xd31   : > { %v2069_v30 = vsel %vm740_vm3, %v2058_v47, 0  ;;  %3581 = vmatprep.subr.msk.bf16.mxu0 %vm740_vm3, %v2058_v47 }
 0xd32   : > { %3476 = vmatpush3.bf16.xpose.msra.mxu0 %v2069_v30 }
 0xd3a   : > { %v2056_v49 = vpop.permute.xlu1 %2055 }
 0xd3b   : > { %v2066_v35 = vsel %vm740_vm3, %v2056_v49, 0  ;;  %3582 = vmatprep.subr.msk.bf16.mxu0 %vm740_vm3, %v2056_v49 }
 0xd3c   : > { %3478 = vmatpush3.bf16.xpose.msra.mxu0 %v2066_v35  ;;  %v2124_v59 = vpop.permute.xlu0 %2123 }
 0xd3d   : > { %v2135_v62 = vsel %vm740_vm3, %v2124_v59, 0  ;;  %3583 = vmatprep.subr.msk.bf16.mxu1 %vm740_vm3, %v2124_v59 }
 0xd3e   : > { %3484 = vmatpush3.bf16.xpose.msra.mxu1 %v2135_v62 }
 0xd40   : > { %v2190_v5 = vpop.permute.xlu1 %2189  ;;  %v2122_v12 = vpop.permute.xlu0 %2121 }
 0xd41   : > { %3584 = vmatprep.subr.msk.bf16.mxu1 %vm740_vm3, %v2122_v12  ;;  %3585 = vmatprep.subr.msk.bf16.mxu0 %vm740_vm3, %v2190_v5  ;;  %v2201_v24 = vsel %vm740_vm3, %v2190_v5, 0  ;;  %v2132_v52 = vsel %vm740_vm3, %v2122_v12, 0 }
 0xd43   : > { %3480 = vmatmul.mubr.msk.bf16.vlgmr.msra.gmra.mxu0 %vm740_vm3, %v4497_v50 }
 0xd44   : > { %3492 = vmatpush3.bf16.xpose.msra.mxu0 %v2201_v24  ;;  %3495 = vmatprep.mubr.msk.bf16.mxu0 %vm740_vm3, %v4523_v36 }
 0xd46   : > { %v2188_v26 = vpop.permute.xlu1 %2187  ;;  %3486 = vmatpush3.bf16.xpose.msra.mxu1 %v2132_v52 }
 0xd47   : > { %3586 = vmatprep.subr.msk.bf16.mxu0 %vm740_vm3, %v2188_v26  ;;  %v2198_v54 = vsel %vm740_vm3, %v2188_v26, 0 }
 0xd4c   : > { %3494 = vmatpush3.bf16.xpose.msra.mxu0 %v2198_v54 }
 0xd4d   : > { %3488 = vmatmul.mubr.msk.bf16.vlgmr.msra.gmra.mxu1 %vm740_vm3, %v4504_v1 }
 0xd53   : > { %3496 = vmatmul.mubr.msk.bf16.vlgmr.msra.gmra.mxu0 %vm740_vm3, %v4515_v20 }
 0xd98   : > { %v3473_v8 = vpop.f32.mrf.mxu1 }
 0xd99   : > { %v2253_v37 = vmul.f32 0.35355338, %v3473_v8 }
 0xd9a   : > { %v2039_v29 = vpop.f32.mrf.mxu1 }
 0xd9b   : > { %v2251_v53 = vmul.f32 0.35355338, %v2039_v29  ;;  %v4552_v32 = vadd.f32 %v2253_v37, %v4154_v25 }
 0xd9c   : > { %v3474_v61 = vpop.f32.mrf.mxu1 }
 0xd9d   : > { %v2281_v46 = vsel %vm1030_vm12, %v4552_v32, -inf  ;;  %v4557_v6 = vadd.f32 %v2251_v53, %v4156_v33 }
 0xd9e   : > { %2282 = vmax.xlane.f32.xlu0 %v2281_v46  ;;  %v2042_v9 = vpop.f32.mrf.mxu1 }
 0xd9f   : > { %v2252_v48 = vmul.f32 0.35355338, %v2042_v9  ;;  %v2275_v13 = vsel %vm1023_vm14, %v4557_v6, -inf }
 0xda1   : > { %v4562_v14 = vadd.f32 %v2252_v48, %v4166_v40 }
 0xda2   : > { %2276 = vmax.xlane.f32.xlu0 %v2275_v13 }
 0xda3   : > { %v2278_v15 = vsel %vm1023_vm14, %v4562_v14, -inf }
 0xda4   : > { %2279 = vmax.xlane.f32.xlu1 %v2278_v15 }
 0xe03   : > { %v3481_v23 = vpop.f32.mrf.mxu0 }
 0xe04   : > { %v2256_v19 = vmul.f32 0.35355338, %v3481_v23 }
 0xe05   : > { %v2105_v44 = vpop.f32.mrf.mxu0 }
 0xe06   : > { %v2254_v56 = vmul.f32 0.35355338, %v2105_v44  ;;  %v4567_v18 = vadd.f32 %v2256_v19, %v4154_v25 }
 0xe07   : > { %v3482_v4 = vpop.f32.mrf.mxu0 }
 0xe08   : > { %v2290_v22 = vsel %vm1030_vm12, %v4567_v18, -inf  ;;  %v4572_v51 = vadd.f32 %v2254_v56, %v4156_v33 }
 0xe09   : > { %2291 = vmax.xlane.f32.xlu1 %v2290_v22  ;;  %v2108_v34 = vpop.f32.mrf.mxu0 }
 0xe0a   : > { %v2284_v31 = vsel %vm1023_vm14, %v4572_v51, -inf  ;;  %v2255_v42 = vmul.f32 0.35355338, %v2108_v34 }
 0xe0b   : > { %2285 = vmax.xlane.f32.xlu0 %v2284_v31 }
 0xe0c   : > { %v4580_v43 = vadd.f32 %v2255_v42, %v4166_v40 }
 0xe0d   : > { %v3489_v60 = vpop.f32.mrf.mxu1 }
 0xe0e   : > { %v2259_v49 = vmul.f32 0.35355338, %v3489_v60  ;;  %v2287_v52 = vsel %vm1023_vm14, %v4580_v43, -inf }
 0xe0f   : > { %v2171_v57 = vpop.f32.mrf.mxu1 }
 0xe10   : > { %v2257_v16 = vmul.f32 0.35355338, %v2171_v57  ;;  %v4590_v26 = vadd.f32 %v2259_v49, %v4154_v25 }
 0xe11   : > { %v3490_v17 = vpop.f32.mrf.mxu1 }
 0xe12   : > { %v4577_v39 = vadd.f32 %v2257_v16, %v4156_v33  ;;  %v2299_v9 = vsel %vm1030_vm12, %v4590_v26, -inf }
 0xe13   : > { %v2174_v47 = vpop.f32.mrf.mxu1  ;;  %v3497_v30 = vpop.f32.mrf.mxu0 }
 0xe14   : > { %v2258_v35 = vmul.f32 0.35355338, %v2174_v47  ;;  %v2293_v59 = vsel %vm1023_vm14, %v4577_v39, -inf  ;;  %v2262_v54 = vmul.f32 0.35355338, %v3497_v30 }
 0xe15   : > { %v2237_v62 = vpop.f32.mrf.mxu0  ;;  %2294 = vmax.xlane.f32.xlu0 %v2293_v59 }
 0xe16   : > { %v4585_v5 = vadd.f32 %v2258_v35, %v4166_v40  ;;  %v2260_v12 = vmul.f32 0.35355338, %v2237_v62  ;;  %v4598_v61 = vadd.f32 %v2262_v54, %v4154_v25 }
 0xe17   : > { %v3498_v24 = vpop.f32.mrf.mxu0 }
 0xe18   : > { %v4593_v8 = vadd.f32 %v2260_v12, %v4156_v33  ;;  %v2296_v37 = vsel %vm1023_vm14, %v4585_v5, -inf  ;;  %v2308_v13 = vsel %vm1030_vm12, %v4598_v61, -inf }
 0xe19   : > { %v2240_v29 = vpop.f32.mrf.mxu0  ;;  %2288 = vmax.xlane.f32.xlu0 %v2287_v52  ;;  %2297 = vmax.xlane.f32.xlu1 %v2296_v37 }
 0xe1a   : > { %v2261_v53 = vmul.f32 0.35355338, %v2240_v29  ;;  %v2302_v33 = vsel %vm1023_vm14, %v4593_v8, -inf }
 0xe1c   : > { %v4601_v46 = vadd.f32 %v2261_v53, %v4166_v40 }
 0xe1d   : > { %2300 = vmax.xlane.f32.xlu0 %v2299_v9  ;;  %2303 = vmax.xlane.f32.xlu1 %v2302_v33 }
 0xe1e   : > { %v2305_v48 = vsel %vm1023_vm14, %v4601_v46, -inf }
 0xe21   : > { %2306 = vmax.xlane.f32.xlu0 %v2305_v48  ;;  %2309 = vmax.xlane.f32.xlu1 %v2308_v13 }
 0xe27   : > { %v2283_v25 = vpop.xlane.xlu0 %2282 }
 0xe28   : > { %v2313_v40 = vsub.f32 %v4552_v32, %v2283_v25 }
 0xe2b   : > { %v2277_v15 = vpop.xlane.xlu0 %2276 }
 0xe2c   : > { %v2311_v23 = vsub.f32 %v4557_v6, %v2277_v15 }
 0xe2e   : > { %v2323_v19 = vmul.f32 1.442695, %v2311_v23 }
 0xe32   : > { %2415 = vrot.lane.b32.xlu1 %v4482_v55, %s3882_s8  ;;  %v2327_v55 = vmul.f32 1.442695, %v2313_v40 }
 0xe34   : > { %3800 = vpow2.f32 %v2327_v55 }
 0xe35   : > { %3802 = vpow2.f32 %v2323_v19 }
 0xe36   : > { %2479 = vrot.lane.b32.xlu1 %v4497_v50, %s3882_s8  ;;  %v2280_v50 = vpop.xlane.xlu1 %2279 }
 0xe37   : > { %2417 = vrot.lane.b32.xlu0 %v4488_v0, %s3882_s8  ;;  %v2312_v0 = vsub.f32 %v4562_v14, %v2280_v50 }
 0xe3a   : > { %2477 = vrot.lane.b32.xlu1 %v4501_v21, %s3882_s8  ;;  %v2325_v21 = vmul.f32 1.442695, %v2312_v0 }
 0xe3b   : > { %2541 = vrot.lane.b32.xlu0 %v4504_v1, %s3882_s8 }
 0xe3c   : > { %3804 = vpow2.f32 %v2325_v21 }
 0xe3e   : > { %2603 = vrot.lane.b32.xlu1 %v4515_v20, %s3882_s8 }
 0xe41   : > { %v4626_v44 = vpop.eup %3800 }
 0xe42   : > { %v2353_v1 = vsel %vm1030_vm12, %v4626_v44, 0.0  ;;  %v4630_v20 = vpop.eup %3802 }
 0xe43   : > { %v2347_v32 = vsel %vm1023_vm14, %v4630_v20, 0.0 }
 0xe49   : > { %v4634_v6 = vpop.eup %3804 }
 0xe4a   : > { %v2350_v14 = vsel %vm1023_vm14, %v4634_v6, 0.0 }
 0xe5a   : > { %2354 = vadd.xlane.f32.xlu0 %v2353_v1 }
 0xe5e   : > { %2348 = vadd.xlane.f32.xlu0 %v2347_v32 }
 0xe62   : > { %2351 = vadd.xlane.f32.xlu1 %v2350_v14 }
 0xe92   : > { %v2292_v56 = vpop.xlane.xlu1 %2291 }
 0xe93   : > { %v2316_v4 = vsub.f32 %v4567_v18, %v2292_v56 }
 0xe94   : > { %v2286_v22 = vpop.xlane.xlu0 %2285 }
 0xe95   : > { %v2333_v31 = vmul.f32 1.442695, %v2316_v4  ;;  %v2314_v34 = vsub.f32 %v4572_v51, %v2286_v22 }
 0xe97   : > { %3806 = vpow2.f32 %v2333_v31  ;;  %v2329_v60 = vmul.f32 1.442695, %v2314_v34 }
 0xe99   : > { %3808 = vpow2.f32 %v2329_v60 }
 0xe9e   : > { %v2295_v42 = vpop.xlane.xlu0 %2294 }
 0xe9f   : > { %v2317_v30 = vsub.f32 %v4577_v39, %v2295_v42 }
 0xea1   : > { %v2335_v12 = vmul.f32 1.442695, %v2317_v30 }
 0xea2   : > { %v2289_v57 = vpop.xlane.xlu0 %2288  ;;  %v2298_v16 = vpop.xlane.xlu1 %2297 }
 0xea3   : > { %v2318_v17 = vsub.f32 %v4585_v5, %v2298_v16  ;;  %v2315_v24 = vsub.f32 %v4580_v43, %v2289_v57 }
 0xea4   : > { %v4641_v47 = vpop.eup %3806 }
 0xea5   : > { %v2337_v49 = vmul.f32 1.442695, %v2318_v17  ;;  %v2362_v18 = vsel %vm1030_vm12, %v4641_v47, 0.0  ;;  %v2331_v53 = vmul.f32 1.442695, %v2315_v24 }
 0xea6   : > { %v4646_v35 = vpop.eup %3808  ;;  %v2301_v59 = vpop.xlane.xlu0 %2300  ;;  %2363 = vadd.xlane.f32.xlu1 %v2362_v18 }
 0xea7   : > { %v2304_v51 = vpop.xlane.xlu1 %2303  ;;  %v2319_v62 = vsub.f32 %v4590_v26, %v2301_v59  ;;  %3810 = vpow2.f32 %v2337_v49  ;;  %v2356_v52 = vsel %vm1023_vm14, %v4646_v35, 0.0 }
 0xea8   : > { %v2320_v39 = vsub.f32 %v4593_v8, %v2304_v51 }
 0xea9   : > { %v2339_v5 = vmul.f32 1.442695, %v2319_v62 }
 0xeaa   : > { %v2307_v54 = vpop.xlane.xlu0 %2306  ;;  %2357 = vadd.xlane.f32.xlu1 %v2356_v52  ;;  %v2341_v33 = vmul.f32 1.442695, %v2320_v39 }
 0xeab   : > { %v2310_v37 = vpop.xlane.xlu1 %2309  ;;  %3812 = vpow2.f32 %v2339_v5  ;;  %v2321_v26 = vsub.f32 %v4601_v46, %v2307_v54 }
 0xeac   : > { %v2322_v29 = vsub.f32 %v4598_v61, %v2310_v37  ;;  %3814 = vpow2.f32 %v2335_v12 }
 0xead   : > { %v2343_v8 = vmul.f32 1.442695, %v2321_v26 }
 0xeae   : > { %v2345_v9 = vmul.f32 1.442695, %v2322_v29  ;;  %v2418_v48 = vpop.permute.xlu0 %2417 }
 0xeaf   : > { %v2416_v43 = vpop.permute.xlu1 %2415  ;;  %v2427_v13 = vsel %vm1176_vm15, %v2418_v48, 0  ;;  %3587 = vmatprep.subr.msk.bf16.mxu1 %vm1176_vm15, %v2418_v48 }
 0xeb0   : > { %3816 = vpow2.f32 %v2345_v9  ;;  %3500 = vmatpush3.bf16.msra.mxu1 %v2427_v13 }
 0xeb1   : > { %3818 = vpow2.f32 %v2331_v53  ;;  %3501 = vmatprep.subr.bf16.mxu1 %v2416_v43 }
 0xeb2   : > { %3820 = vpow2.f32 %v2341_v33  ;;  %v2542_v25 = vpop.permute.xlu0 %2541 }
 0xeb3   : > { %v2551_v61 = vsel %vm1176_vm15, %v2542_v25, 0  ;;  %3589 = vmatprep.subr.msk.bf16.mxu0 %vm1176_vm15, %v2542_v25  ;;  %v2480_v46 = vpop.permute.xlu1 %2479  ;;  %3822 = vpow2.f32 %v2343_v8 }
 0xeb4   : > { %3502 = vmatpush3.bf16.msra.mxu1 %v2416_v43  ;;  %3516 = vmatpush3.bf16.msra.mxu0 %v2551_v61  ;;  %v4659_v40 = vpop.eup %3810  ;;  %v2489_v59 = vsel %vm1176_vm15, %v2480_v46, 0 }
 0xeb5   : > { %3588 = vmatprep.subr.msk.bf16.mxu1 %vm1176_vm15, %v2480_v46  ;;  %v2368_v15 = vsel %vm1023_vm14, %v4659_v40, 0.0 }
 0xeb6   : > { %2369 = vadd.xlane.f32.xlu1 %v2368_v15 }
 0xeb7   : > { %v2478_v31 = vpop.permute.xlu1 %2477 }
 0xeb8   : > { %v4664_v55 = vpop.eup %3812 }
 0xeb9   : > { %v2371_v23 = vsel %vm1030_vm12, %v4664_v55, 0.0  ;;  %v4668_v50 = vpop.eup %3814 }
 0xeba   : > { %2372 = vadd.xlane.f32.xlu0 %v2371_v23  ;;  %v2365_v0 = vsel %vm1023_vm14, %v4668_v50, 0.0 }
 0xebb   : > { %v4694_v60 = vpop.permute.xlu1 %2603 }
 0xebd   : > { %v4670_v19 = vpop.eup %3816 }
 0xebe   : > { %v4674_v21 = vpop.eup %3818  ;;  %2366 = vadd.xlane.f32.xlu0 %v2365_v0  ;;  %v2380_v1 = vsel %vm1030_vm12, %v4670_v19, 0.0 }
 0xebf   : > { %v4678_v32 = vpop.eup %3820  ;;  %2381 = vadd.xlane.f32.xlu1 %v2380_v1  ;;  %v2359_v14 = vsel %vm1023_vm14, %v4674_v21, 0.0 }
 0xec0   : > { %v4682_v56 = vpop.eup %3822  ;;  %v2374_v4 = vsel %vm1023_vm14, %v4678_v32, 0.0 }
 0xec1   : > { %v2377_v22 = vsel %vm1023_vm14, %v4682_v56, 0.0 }
 0xec2   : > { %2360 = vadd.xlane.f32.xlu0 %v2359_v14 }
 0xec3   : > { %2375 = vadd.xlane.f32.xlu1 %v2374_v4 }
 0xec6   : > { %2378 = vadd.xlane.f32.xlu0 %v2377_v22 }
 0xed4   : > { %2601 = vrot.lane.b32.xlu1 %v4523_v36, %s3882_s8 }
 0xedc   : > { %2539 = vrot.lane.b32.xlu0 %v4513_v3, %s3882_s8 }
 0xee0   : > { %2712 = vrot.lane.b32.xlu0 %v4451_v10, %s3883_s10 }
 0xee3   : > { %v2355_v34 = vpop.xlane.xlu0 %2354 }
 0xee4   : > { %3824 = vrcp.f32 %v2355_v34 }
 0xee7   : > { %v2349_v42 = vpop.xlane.xlu0 %2348 }
 0xee8   : > { %3826 = vrcp.f32 %v2349_v42 }
 0xeeb   : > { %v2352_v57 = vpop.xlane.xlu1 %2351 }
 0xeec   : > { %3828 = vrcp.f32 %v2352_v57 }
 0xef1   : > { %v3825_v16 = vpop.eup %3824 }
 0xef2   : > { %v2397_v36 = vmul.f32 %v3825_v16, %v4626_v44 }
 0xef4   : > { %v2408_v10 = vpack.c.bf16 %v2397_v36, %v2397_v36 }
 0xef5   : > { %v3827_v17 = vpop.eup %3826 }
 0xef6   : > { %v2395_v49 = vmul.f32 %v3827_v17, %v4630_v20 }
 0xef9   : > { %v3829_v30 = vpop.eup %3828 }
 0xefa   : > { %v2396_v3 = vmul.f32 %v3829_v30, %v4634_v6 }
 0xefc   : > { %v2407_v18 = vpack.c.bf16 %v2396_v3, %v2395_v49 }
 0xefe   : > { %3503 = vmatprep.mubr.msk.bf16.mxu1 %vm1023_vm14, %v2407_v18 }
 0xeff   : > { %3504 = vmatmul.mubr.msk.bf16.vlgmr.msra.gmra.mxu1 %vm1023_vm14, %v2408_v10 }
 0xf00   : > { %3508 = vmatpush3.bf16.msra.mxu1 %v2489_v59 }
 0xf01   : > { %3509 = vmatprep.subr.bf16.mxu1 %v2478_v31 }
 0xf04   : > { %3510 = vmatpush3.bf16.msra.mxu1 %v2478_v31 }
 0xf05   : > { %3590 = vmatprep.subr.msk.bf16.mxu1 %vm1176_vm15, %v4694_v60 }
 0xf2f   : > { %v2364_v51 = vpop.xlane.xlu1 %2363 }
 0xf33   : > { %v2358_v44 = vpop.xlane.xlu1 %2357 }
 0xf3f   : > { %v2370_v62 = vpop.xlane.xlu1 %2369 }
 0xf43   : > { %v2373_v20 = vpop.xlane.xlu0 %2372 }
 0xf44   : > { %3830 = vrcp.f32 %v2373_v20 }
 0xf45   : > { %3832 = vrcp.f32 %v2370_v62 }
 0xf47   : > { %v2367_v6 = vpop.xlane.xlu0 %2366 }
 0xf48   : > { %3834 = vrcp.f32 %v2367_v6  ;;  %v2382_v12 = vpop.xlane.xlu1 %2381 }
 0xf49   : > { %3836 = vrcp.f32 %v2364_v51 }
 0xf4a   : > { %3838 = vrcp.f32 %v2358_v44 }
 0xf4b   : > { %v2361_v24 = vpop.xlane.xlu0 %2360 }
 0xf4c   : > { %3840 = vrcp.f32 %v2361_v24  ;;  %v2376_v5 = vpop.xlane.xlu1 %2375 }
 0xf4d   : > { %3842 = vrcp.f32 %v2376_v5 }
 0xf4f   : > { %v2379_v52 = vpop.xlane.xlu0 %2378 }
 0xf50   : > { %3844 = vrcp.f32 %v2379_v52 }
 0xf51   : > { %3846 = vrcp.f32 %v2382_v12  ;;  %v3831_v39 = vpop.eup %3830 }
 0xf52   : > { %v3833_v54 = vpop.eup %3832  ;;  %v2403_v53 = vmul.f32 %v3831_v39, %v4664_v55 }
 0xf53   : > { %v2540_v37 = vpop.permute.xlu0 %2539  ;;  %v2402_v33 = vmul.f32 %v3833_v54, %v4659_v40 }
 0xf54   : > { %3517 = vmatprep.subr.bf16.mxu0 %v2540_v37  ;;  %v2412_v8 = vpack.c.bf16 %v2403_v53, %v2403_v53 }
 0xf55   : > { %v3835_v29 = vpop.eup %3834  ;;  %3518 = vmatpush3.bf16.msra.mxu0 %v2540_v37 }
 0xf56   : > { %v3837_v26 = vpop.eup %3836  ;;  %v2401_v9 = vmul.f32 %v3835_v29, %v4668_v50 }
 0xf57   : > { %v3839_v48 = vpop.eup %3838  ;;  %v2400_v25 = vmul.f32 %v3837_v26, %v4641_v47  ;;  %v2613_v47 = vsel %vm1176_vm15, %v4694_v60, 0 }
 0xf58   : > { %v2411_v43 = vpack.c.bf16 %v2402_v33, %v2401_v9  ;;  %v2398_v61 = vmul.f32 %v3839_v48, %v4646_v35  ;;  %v2602_v35 = vpop.permute.xlu1 %2601 }
 0xf59   : > { %v3841_v13 = vpop.eup %3840  ;;  %v2410_v50 = vpack.c.bf16 %v2400_v25, %v2400_v25 }
 0xf5a   : > { %3519 = vmatprep.mubr.msk.bf16.mxu0 %vm1023_vm14, %v2411_v43  ;;  %v2399_v46 = vmul.f32 %v3841_v13, %v4674_v21  ;;  %v3843_v15 = vpop.eup %3842 }
 0xf5b   : > { %3520 = vmatmul.mubr.msk.bf16.vlgmr.msra.gmra.mxu0 %vm1023_vm14, %v2412_v8  ;;  %v2404_v40 = vmul.f32 %v3843_v15, %v4678_v32  ;;  %v2713_v32 = vpop.permute.xlu0 %2712 }
 0xf5c   : > { %v2409_v55 = vpack.c.bf16 %v2399_v46, %v2398_v61  ;;  %3531 = vmatprep.subr.bf16.mxu0 %v2713_v32 }
 0xf5d   : > { %v3845_v23 = vpop.eup %3844  ;;  %3532 = vmatpush3.bf16.msra.mxu0 %v2713_v32 }
 0xf5e   : > { %v3847_v0 = vpop.eup %3846  ;;  %3511 = vmatprep.mubr.msk.bf16.mxu1 %vm1023_vm14, %v2409_v55  ;;  %v2405_v1 = vmul.f32 %v3845_v23, %v4682_v56  ;;  %v2776_v55 = vrot.slane %v4465_v41, %v1528_v7 }
 0xf5f   : > { %3512 = vmatmul.mubr.msk.bf16.vlgmr.msra.gmra.mxu1 %vm1023_vm14, %v2410_v50  ;;  %v2406_v14 = vmul.f32 %v3847_v0, %v4670_v19 }
 0xf60   : > { %3524 = vmatpush3.bf16.msra.mxu1 %v2613_v47  ;;  %v2413_v21 = vpack.c.bf16 %v2405_v1, %v2404_v40 }
 0xf61   : > { %3525 = vmatprep.subr.bf16.mxu1 %v2602_v35  ;;  %v2414_v4 = vpack.c.bf16 %v2406_v14, %v2406_v14 }
 0xf62   : > { %3527 = vmatprep.mubr.msk.bf16.mxu1 %vm1023_vm14, %v2413_v21 }
 0xf64   : > { %3526 = vmatpush3.bf16.msra.mxu1 %v2602_v35 }
 0xf67   : > { %3528 = vmatmul.mubr.msk.bf16.vlgmr.msra.gmra.mxu1 %vm1023_vm14, %v2414_v4 }
 0xfbf   : > { %v3505_v56 = vpop.f32.mrf.mxu1 }
 0xfc1   : > { %v2463_v22 = vpop.f32.mrf.mxu1 }
 0xfc3   : > { %v3506_v31 = vpop.f32.mrf.mxu1 }
 0xfc5   : > { %v2466_v60 = vpop.f32.mrf.mxu1 }
0x101b   : > { %v3521_v34 = vpop.f32.mrf.mxu0 }
0x101d   : > { %v2587_v42 = vpop.f32.mrf.mxu0 }
0x101f   : > { %v3513_v57 = vpop.f32.mrf.mxu1  ;;  %v3522_v16 = vpop.f32.mrf.mxu0 }
0x1020   : > { %2670 = vrot.lane.b32.xlu0 %v3513_v57, %s3884_s11 }
0x1021   : > { %v2525_v19 = vpop.f32.mrf.mxu1  ;;  %v2590_v49 = vpop.f32.mrf.mxu0 }
0x1022   : > { %v3661_v10 = vpack.i.bf16 %v2590_v49, %v2587_v42  ;;  %v3707_v42 = vld [vmem:[%s4831_s3 + $0x24] ss:$8 sps:$4 sm:$0xff]  }
0x1023   : > { %v3514_v17 = vpop.f32.mrf.mxu1 }
0x1024   : > { %2682 = vrot.lane.b32.xlu0 %v3521_v34, %s3886_s13 }
0x1025   : > { %v2528_v30 = vpop.f32.mrf.mxu1 }
0x1026   : > { %v3656_v36 = vpack.i.bf16 %v2528_v30, %v2525_v19 }
0x1027   : > { %v3529_v3 = vpop.f32.mrf.mxu1 }
0x1028   : > { %3657 = vrot.lane.b32.xlu1 %v3656_v36, %s3884_s11  ;;  %2710 = vrot.lane.b32.xlu0 %v4457_v38, %s3883_s10  ;;  %s278_s11 = scalar_lea.vmem %s4835_s7, %s3591_s9 }
0x1029   : > { %v2649_v18 = vpop.f32.mrf.mxu1 }
0x102b   : > { %v3530_v59 = vpop.f32.mrf.mxu1 }
0x102c   : > { %3662 = vrot.lane.b32.xlu1 %v3661_v10, %s3886_s13 }
0x102d   : > { %v2652_v51 = vpop.f32.mrf.mxu1 }
0x102e   : > { %v3666_v44 = vpack.i.bf16 %v2652_v51, %v2649_v18 }
0x1030   : > { %3667 = vrot.lane.b32.xlu1 %v3666_v44, %s3885_s12 }
0x1034   : > { %2694 = vrot.lane.b32.xlu1 %v3529_v3, %s3885_s12 }
0x1092   : > { %v2671_v62 = vpop.permute.xlu0 %2670 }
0x1093   : > { %v2701_v48 = vsel %vm740_vm3, %v3505_v56, %v2671_v62 }
0x1096   : > { %v2683_v20 = vpop.permute.xlu0 %2682 }
0x1097   : > { %v2704_v8 = vsel %vm1453_vm0, %v2701_v48, %v2683_v20 }
0x109a   : > { %v3658_v6 = vpop.permute.xlu1 %3657  ;;  %v2711_v12 = vpop.permute.xlu0 %2710 }
0x109b   : > { %3533 = vmatprep.subr.bf16.mxu0 %v2711_v12  ;;  %v3660_v5 = vunpack.i.h.bf16 %v3658_v6  ;;  %v3659_v38 = vunpack.i.l.bf16 %v3658_v6 }
0x109c   : > { %3534 = vmatpush3.bf16.msra.mxu0 %v2711_v12 }
0x109d   : > { %v2700_v37 = vsel %vm740_vm3, %v2466_v60, %v3660_v5  ;;  %v2699_v29 = vsel %vm740_vm3, %v2463_v22, %v3659_v38  ;;  %v3706_v60 = vld [vmem:[%s4831_s3 + $0x34] ss:$8 sps:$4 sm:$0xff]   ;;  %3547 = vmatprep.subr.bf16.mxu0 %v3708_v58 }
0x109e   : > { %v3663_v24 = vpop.permute.xlu1 %3662  ;;  %3539 = vmatprep.subr.bf16.mxu1 %v3706_v60 }
0x109f   : > { %v3665_v52 = vunpack.i.h.bf16 %v3663_v24  ;;  %v3664_v39 = vunpack.i.l.bf16 %v3663_v24  ;;  %3540 = vmatpush3.bf16.msra.mxu1 %v3706_v60 }
0x10a0   : > { %3541 = vmatprep.subr.bf16.mxu1 %v3707_v42 }
0x10a1   : > { %v2702_v9 = vsel %vm1453_vm0, %v2699_v29, %v3664_v39  ;;  %v2703_v33 = vsel %vm1453_vm0, %v2700_v37, %v3665_v52 }
0x10a2   : > { %v3668_v54 = vpop.permute.xlu1 %3667 }
0x10a3   : > { %v3670_v53 = vunpack.i.h.bf16 %v3668_v54  ;;  %v3669_v26 = vunpack.i.l.bf16 %v3668_v54  ;;  %3542 = vmatpush3.bf16.msra.mxu1 %v3707_v42 }
0x10a5   : > { %v2705_v43 = vsel %vm1457_vm4, %v2702_v9, %v3669_v26  ;;  %v2706_v13 = vsel %vm1457_vm4, %v2703_v33, %v3670_v53  ;;  %v2828_v53 = vrot.slane %v4465_v41, %v1580_v28  ;;  %v3710_v28 = vld [vmem:[%s4832_s4 + $0x68] sm:$0xff]  }
0x10a6   : > { %v2708_v25 = vpack.c.bf16 %v2706_v13, %v2705_v43  ;;  %v2695_v61 = vpop.permute.xlu1 %2694 }
0x10a7   : > { %v2707_v46 = vsel %vm1457_vm4, %v2704_v8, %v2695_v61  ;;  %v2835_v8 = vrot.slane %v4465_v41, %v4012_v63  ;;  %v3709_v63 = vld [vmem:[%s4832_s4 + $0x70] sm:$0xff]   ;;  %v3711_v41 = vld [vmem:[%s4832_s4 + $0x60] sm:$0xff]  }
0x10a8   : > { %v2709_v15 = vpack.c.bf16 %v2707_v46, %v2707_v46  ;;  %3535 = vmatprep.mubr.msk.bf16.mxu0 %vm452_vm1, %v2708_v25 }
0x10aa   : > { %3536 = vmatmul.mubr.msk.bf16.vlgmr.msra.gmra.mxu0 %vm452_vm1, %v2709_v15 }
0x10ab   : > { %3548 = vmatpush3.bf16.msra.mxu0 %v3708_v58 }
0x10ac   : > { %3549 = vmatprep.subr.bf16.mxu0 %v3709_v63 }
0x10af   : > { %3550 = vmatpush3.bf16.msra.mxu0 %v3709_v63 }
0x10b0   : > { %3551 = vmatprep.subr.bf16.mxu0 %v3710_v28 }
0x10b3   : > { %3552 = vmatpush3.bf16.msra.mxu0 %v3710_v28 }
0x10b4   : > { %3553 = vmatprep.subr.bf16.mxu0 %v3711_v41 }
0x10b7   : > { %3554 = vmatpush3.bf16.msra.mxu0 %v3711_v41 }
0x116a   : > { %v3537_v23 = vpop.f32.mrf.mxu0 }
0x116b   : > { %v2772_v50 = vadd.f32 %v3537_v23, %v4425_v27 }
0x116c   : > { %v2756_v0 = vpop.f32.mrf.mxu0 }
0x116d   : > { %v4744_v40 = vadd.f32 %v2776_v55, %v2772_v50  ;;  %v2770_v1 = vadd.f32 %v2756_v0, %v4428_v45  ;;  %v3712_v0 = vld [vmem:[%s4832_s4 + $0x58] sm:$0xff]  }
0x116e   : > { %v3538_v47 = vpop.f32.mrf.mxu0  ;;  %3555 = vmatprep.subr.bf16.mxu0 %v3712_v0 }
0x116f   : > { %v4747_v35 = vadd.f32 %v2776_v55, %v2770_v1  ;;  %v2786_v21 = vsel %vm459_vm2, %v4744_v40, 0.0  ;;  %v2794_v56 = vmul.f32 %v4744_v40, %v4744_v40  ;;  %3556 = vmatpush3.bf16.msra.mxu0 %v3712_v0  ;;  %v3713_v1 = vld [vmem:[%s4832_s4 + $0x50] sm:$0xff]   ;;  %v3714_v47 = vld [vmem:[%s4832_s4 + $0x48] sm:$0xff]  }
0x1170   : > { %2787 = vadd.xlane.f32.xlu0 %v2786_v21  ;;  %v2759_v14 = vpop.f32.mrf.mxu0  ;;  %3557 = vmatprep.subr.bf16.mxu0 %v3713_v1  ;;  %v3715_v21 = vld [vmem:[%s4832_s4 + $0x40] sm:$0xff]  }
0x1171   : > { %v2771_v4 = vadd.f32 %v2759_v14, %v4435_v11  ;;  %v2780_v7 = vsel %vm452_vm1, %v4747_v35, 0.0  ;;  %v2792_v27 = vmul.f32 %v4747_v35, %v4747_v35  ;;  %v2801_v31 = vsel %vm459_vm2, %v2794_v56, 0.0  ;;  %v3209_v14 = vld [vmem:[%s4834_s6 + $0x3] ss:$0 sm:$0xff] }
0x1173   : > { %v4752_v32 = vadd.f32 %v2776_v55, %v2771_v4  ;;  %v2795_v22 = vsel %vm452_vm1, %v2792_v27, 0.0  ;;  %3558 = vmatpush3.bf16.msra.mxu0 %v3713_v1 }
0x1174   : > { %2781 = vadd.xlane.f32.xlu0 %v2780_v7  ;;  %3559 = vmatprep.subr.bf16.mxu0 %v3714_v47 }
0x1175   : > { %v2783_v45 = vsel %vm452_vm1, %v4752_v32, 0.0  ;;  %v2793_v11 = vmul.f32 %v4752_v32, %v4752_v32 }
0x1176   : > { %2784 = vadd.xlane.f32.xlu1 %v2783_v45 }
0x1177   : > { %v2798_v34 = vsel %vm452_vm1, %v2793_v11, 0.0  ;;  %3560 = vmatpush3.bf16.msra.mxu0 %v3714_v47 }
0x1178   : > { %2796 = vadd.xlane.f32.xlu0 %v2795_v22  ;;  %3561 = vmatprep.subr.bf16.mxu0 %v3715_v21 }
0x117a   : > { %2802 = vadd.xlane.f32.xlu1 %v2801_v31 }
0x117b   : > { %3562 = vmatpush3.bf16.msra.mxu0 %v3715_v21 }
0x117c   : > { %2799 = vadd.xlane.f32.xlu0 %v2798_v34 }
0x11f9   : > { %v2788_v57 = vpop.xlane.xlu0 %2787 }
0x11fa   : > { %v2791_v30 = vmul.f32 0.03125, %v2788_v57 }
0x11fc   : > { %v2809_v59 = vmul.f32 %v2791_v30, %v2791_v30  ;;  %v2815_v37 = vsub.f32 %v4744_v40, %v2791_v30 }
0x11fd   : > { %v2782_v16 = vpop.xlane.xlu0 %2781 }
0x11fe   : > { %v2789_v19 = vmul.f32 0.03125, %v2782_v16 }
0x11ff   : > { %v2785_v17 = vpop.xlane.xlu1 %2784 }
0x1200   : > { %v2807_v49 = vmul.f32 %v2789_v19, %v2789_v19  ;;  %v2790_v3 = vmul.f32 0.03125, %v2785_v17  ;;  %v2813_v39 = vsub.f32 %v4747_v35, %v2789_v19 }
0x1201   : > { %v2797_v36 = vpop.xlane.xlu0 %2796 }
0x1202   : > { %v2804_v18 = vmul.f32 0.03125, %v2797_v36  ;;  %v2808_v20 = vmul.f32 %v2790_v3, %v2790_v3  ;;  %v2814_v9 = vsub.f32 %v4752_v32, %v2790_v3 }
0x1203   : > { %v2803_v10 = vpop.xlane.xlu1 %2802 }
0x1204   : > { %v2810_v51 = vsub.f32 %v2804_v18, %v2807_v49  ;;  %v2806_v44 = vmul.f32 0.03125, %v2803_v10 }
0x1205   : > { %v2800_v62 = vpop.xlane.xlu0 %2799 }
0x1206   : > { %v2816_v6 = vadd.f32 1e-05, %v2810_v51  ;;  %v2812_v12 = vsub.f32 %v2806_v44, %v2809_v59  ;;  %v2805_v24 = vmul.f32 0.03125, %v2800_v62 }
0x1208   : > { %3848 = vrsqrt.f32 %v2816_v6  ;;  %v2818_v5 = vadd.f32 1e-05, %v2812_v12  ;;  %v2811_v38 = vsub.f32 %v2805_v24, %v2808_v20  ;;  %v3867_v12 = vld [vmem:[%s4833_s5 + $0x8] sm:$0xff] }
0x1209   : > { %v3052_v24 = vrot.slane %v3867_v12, %v4015_v2 }
0x120a   : > { %3850 = vrsqrt.f32 %v2818_v5  ;;  %v2817_v52 = vadd.f32 1e-05, %v2811_v38 }
0x120c   : > { %3852 = vrsqrt.f32 %v2817_v52 }
0x1215   : > { %v3849_v54 = vpop.eup %3848 }
0x1216   : > { %v2822_v29 = vmul.f32 %v3849_v54, %v2813_v39 }
0x1217   : > { %v3851_v26 = vpop.eup %3850 }
0x1218   : > { %v2824_v33 = vmul.f32 %v3851_v26, %v2815_v37  ;;  %v2829_v13 = vmul.f32 %v2828_v53, %v2822_v29 }
0x1219   : > { %v3853_v48 = vpop.eup %3852 }
0x121a   : > { %v2823_v43 = vmul.f32 %v3853_v48, %v2814_v9  ;;  %v2831_v25 = vmul.f32 %v2828_v53, %v2824_v33  ;;  %v2836_v15 = vadd.f32 %v2835_v8, %v2829_v13 }
0x121c   : > { %v2830_v61 = vmul.f32 %v2828_v53, %v2823_v43  ;;  %v2838_v46 = vadd.f32 %v2835_v8, %v2831_v25 }
0x121e   : > { %v2837_v55 = vadd.f32 %v2835_v8, %v2830_v61  ;;  %v2840_v50 = vpack.c.bf16 %v2838_v46, %v2838_v46 }
0x1220   : > { %v2839_v23 = vpack.c.bf16 %v2837_v55, %v2836_v15 }
0x1222   : > { %3543 = vmatprep.mubr.msk.bf16.mxu1 %vm452_vm1, %v2839_v23 }
0x1223   : > { %3544 = vmatmul.mubr.msk.bf16.vlgmr.msra.gmra.mxu1 %vm452_vm1, %v2840_v50 }
0x12e3   : > { %v3545_v4 = vpop.f32.mrf.mxu1 }
0x12e4   : > { %v2902_v7 = vadd.f32 %v3545_v4, %v3209_v14 }
0x12e5   : > { %v2893_v27 = vpop.f32.mrf.mxu1 }
0x12e6   : > { %v3216_v45 = vmul.f32 -1.702, %v2902_v7  ;;  %v2894_v56 = vadd.f32 %v3209_v14, %v2893_v27 }
0x12e7   : > { %v3546_v22 = vpop.f32.mrf.mxu1 }
0x12e8   : > { %v2917_v11 = vmul.f32 1.442695, %v3216_v45  ;;  %v3214_v31 = vmul.f32 -1.702, %v2894_v56 }
0x12e9   : > { %v2896_v34 = vpop.f32.mrf.mxu1 }
0x12ea   : > { %3854 = vpow2.f32 %v2917_v11  ;;  %v2913_v60 = vmul.f32 1.442695, %v3214_v31  ;;  %v2897_v42 = vadd.f32 %v3209_v14, %v2896_v34 }
0x12ec   : > { %3856 = vpow2.f32 %v2913_v60  ;;  %v3215_v57 = vmul.f32 -1.702, %v2897_v42 }
0x12ee   : > { %v2915_v16 = vmul.f32 1.442695, %v3215_v57 }
0x12f0   : > { %3858 = vpow2.f32 %v2915_v16 }
0x12f7   : > { %v3855_v19 = vpop.eup %3854 }
0x12f8   : > { %v2921_v30 = vadd.f32 1.0, %v3855_v19 }
0x12f9   : > { %v3857_v17 = vpop.eup %3856 }
0x12fa   : > { %v2919_v36 = vadd.f32 1.0, %v3857_v17  ;;  %3860 = vrcp.f32 %v2921_v30 }
0x12fc   : > { %3862 = vrcp.f32 %v2919_v36 }
0x12fd   : > { %v3859_v49 = vpop.eup %3858 }
0x12fe   : > { %v2920_v3 = vadd.f32 1.0, %v3859_v49 }
0x1300   : > { %3864 = vrcp.f32 %v2920_v3 }
0x1307   : > { %v3861_v18 = vpop.eup %3860 }
0x1308   : > { %v2930_v51 = vmul.f32 %v3861_v18, %v2902_v7 }
0x1309   : > { %v3863_v10 = vpop.eup %3862 }
0x130a   : > { %v2928_v44 = vmul.f32 %v3863_v10, %v2894_v56  ;;  %v2932_v6 = vpack.c.bf16 %v2930_v51, %v2930_v51 }
0x130d   : > { %v3865_v59 = vpop.eup %3864 }
0x130e   : > { %v2929_v62 = vmul.f32 %v3865_v59, %v2897_v42 }
0x1310   : > { %v2931_v20 = vpack.c.bf16 %v2929_v62, %v2928_v44 }
0x1312   : > { %3563 = vmatprep.mubr.bf16.mxu0 %v2931_v20 }
0x1313   : > { %3564 = vmatmul.mubr.bf16.vlgmr.msra.gmra.mxu0 %v2932_v6 }
0x13d3   : > { %v3565_v5 = vpop.f32.mrf.mxu0 }
0x13d4   : > { %v3048_v38 = vadd.f32 %v3565_v5, %v4744_v40 }
0x13d5   : > { %v3032_v52 = vpop.f32.mrf.mxu0 }
0x13d6   : > { %v3055_v39 = vadd.f32 %v3052_v24, %v3048_v38  ;;  %v3046_v54 = vadd.f32 %v3032_v52, %v4747_v35 }
0x13d7   : > { %v3566_v37 = vpop.f32.mrf.mxu0 }
0x13d8   : > { %3058 = vst.msk [vmem:[%s278_s11 + $0x10] sm:$0xf] %vm459_vm2, %v3055_v39  ;;  %v3053_v29 = vadd.f32 %v3052_v24, %v3046_v54 }
0x13d9   : > { %v3035_v53 = vpop.f32.mrf.mxu0 }
0x13da   : > { %3056 = vst.msk [vmem:[%s278_s11] sm:$0xff] %vm452_vm1, %v3053_v29  ;;  %v3047_v2 = vadd.f32 %v3035_v53, %v4752_v32 }
0x13dc   : > { %v3054_v26 = vadd.f32 %v3052_v24, %v3047_v2 }
0x13de   : > { %3057 = vst.msk [vmem:[%s278_s11 + $0x8] sm:$0xff] %vm452_vm1, %v3054_v26 }
0x13df PF: > { %s17_s24 = sadd.s32 1, %s3874_s24  }
0x13e0   : > { %p14_p4 = scmp.ge.s32.totalorder %s17_s24, 4  }
0x13e2   :  { %16 = sbr.rel (!%p14_p4) target bundleno = 1 (0x1), region = 82 }

</bundles_post_ra>
